<compile_context>
chip_gen: v6e
topology: v6e:2x2x1
jax: 0.10.0
libtpu: 0.0.40
codegen_flags: <defaults>
</compile_context>

<pallas_src>
import functools

import numpy as np
import jax
import jax.numpy as jnp
from jax import lax
from jax.experimental import pallas as pl
from jax.experimental.pallas import tpu as pltpu


def _distill_kernel(img_ref, txt_ref, avg_ref,
                    w1_ref, b1_ref, w2_ref, b2_ref,
                    wth_ref, wph_ref, wg_ref, wo_ref,
                    wc1a_ref, wc1b_ref, bc1_ref,
                    bn_g_ref, bn_b_ref, bn_rm_ref, bn_rv_ref,
                    wc2_ref, bc2_ref,
                    prob_ref, loss_ref,
                    *, use_text: bool, num_rn: int, bb: int, N: int, T: int, A: int):
    f32 = jnp.float32
    inv_n = 1.0 / N
    img = img_ref[...]                                            # (bb*N, C) bf16

    # per-image spatial mean: one MXU matmul with a block-averaging matrix
    row = lax.broadcasted_iota(jnp.int32, (bb, bb * N), 0)
    col = lax.broadcasted_iota(jnp.int32, (bb, bb * N), 1)
    sel = jnp.where((col >= row * N) & (col < (row + 1) * N), inv_n, 0.0).astype(f32)
    att_img = jnp.dot(sel, img.astype(f32), preferred_element_type=f32)   # (bb, C)

    # transfer MLP: Linear(C, C//2) -> LeakyReLU(0.01) -> Linear(C//2, Hd) -> Tanh
    h1 = jnp.dot(att_img, w1_ref[...].astype(f32), preferred_element_type=f32) + b1_ref[...]
    h1 = jnp.where(h1 > 0, h1, 0.01 * h1)
    tt = jnp.tanh(jnp.dot(h1, w2_ref[...].astype(f32), preferred_element_type=f32)
                  + b2_ref[...])                                  # (bb, Hd)

    # transfer_loss = elementwise MSE vs the (detached) averaged text feature
    loss_ref[...] = (tt - avg_ref[...]) ** 2

    # gate (static): eval + enable_text() -> text tokens as queries,
    #                no_text_in_test      -> transfer_text as the single query.
    if use_text:
        q = txt_ref[...]                                          # (bb*T, Hd) bf16
        Tq = T
    else:
        q = tt                                                    # (bb, Hd) f32
        Tq = 1

    # fused non-local projections: 3 matmuls cover all R blocks (lane-concat weights)
    g_all = jnp.dot(q, wg_ref[...], preferred_element_type=f32)           # (bb*Tq, R*A)

    if Tq == 1:
        # single-query softmax is identically 1  ->  mean_N(att) @ g == g
        y_cat = g_all                                             # (bb, R*A)
    else:
        theta_all = jnp.dot(img, wth_ref[...], preferred_element_type=f32)  # (bb*N, R*A)
        phi_all = jnp.dot(q, wph_ref[...], preferred_element_type=f32)      # (bb*Tq, R*A)
        rows = []
        for j in range(bb):
            th_j = theta_all[j * N:(j + 1) * N, :]
            ph_j = phi_all[j * Tq:(j + 1) * Tq, :]
            g_j = g_all[j * Tq:(j + 1) * Tq, :]
            pieces = []
            for i in range(num_rn):                               # block-diagonal softmax
                th = th_j[:, i * A:(i + 1) * A]                   # (N, A)
                ph = ph_j[:, i * A:(i + 1) * A]                   # (Tq, A)
                gg = g_j[:, i * A:(i + 1) * A]                    # (Tq, A)
                # scores transposed: (Tq, N) so the token softmax is a sublane reduce
                sc = lax.dot_general(ph, th, (((1,), (1,)), ((), ())),
                                     preferred_element_type=f32)
                sc = sc - jnp.max(sc, axis=0, keepdims=True)
                e = jnp.exp(sc)
                att = e / jnp.sum(e, axis=0, keepdims=True)       # (Tq, N)
                att_mean = jnp.sum(att, axis=1, keepdims=True) * inv_n    # (Tq, 1)
                # mean_N(att @ g) == mean_N(att) @ g  (no (N, A) intermediate)
                pieces.append(jnp.sum(att_mean * gg, axis=0, keepdims=True))  # (1, A)
            rows.append(pieces[0] if len(pieces) == 1 else jnp.concatenate(pieces, axis=1))
        y_cat = rows[0] if bb == 1 else jnp.concatenate(rows, axis=0)      # (bb, R*A)

    # fused output projection: the R*A contraction sums over blocks; residual hoisted
    acc = jnp.dot(y_cat, wo_ref[...].astype(f32), preferred_element_type=f32)  # (bb, C)
    att_ti = acc * (1.0 / num_rn) + att_img

    # classifier: Linear(2C, C) split over the concat halves, BN1d(eval), ReLU,
    #             Linear(C, n_classes), sigmoid (multi-class activation)
    z = (jnp.dot(att_img, wc1a_ref[...].astype(f32), preferred_element_type=f32)
         + jnp.dot(att_ti, wc1b_ref[...].astype(f32), preferred_element_type=f32)
         + bc1_ref[...])
    z = (z - bn_rm_ref[...]) * lax.rsqrt(bn_rv_ref[...] + 1e-5) * bn_g_ref[...] + bn_b_ref[...]
    z = jnp.maximum(z, 0.0)
    logit = jnp.dot(z, wc2_ref[...].astype(f32), preferred_element_type=f32) + bc2_ref[...]
    prob_ref[...] = jax.nn.sigmoid(logit)


def distill_forward(img_feat, last_txt_feat, params, *, use_text=True,
                    compute_dtype=jnp.bfloat16):
    """img_feat: (B, C, H, W) NCHW; last_txt_feat: (B*T, Hd)."""
    B, C, H, W = img_feat.shape
    N = H * W
    augB, Hd = last_txt_feat.shape
    T = augB // B

    (w1, b1, w2, b2, wth, wph, wg, wo,
     wc1a, wc1b, bc1, bn_g, bn_b, bn_rm, bn_rv, wc2, bc2) = params
    R, _, A = wth.shape
    n_classes = wc2.shape[1]

    # ---- layout glue: NCHW -> spatially-major (B*N, C); text token-major; bf16 ----
    img_flat = (img_feat.reshape(B, C, N).transpose(0, 2, 1)
                .reshape(B * N, C).astype(compute_dtype))
    txt_flat = last_txt_feat.astype(compute_dtype)                       # (B*T, Hd)
    avg_txt = jnp.mean(last_txt_feat.reshape(B, T, Hd).astype(jnp.float32), axis=1)  # (B, Hd)

    # ---- fuse the R non-local projection weights along the lane axis ----
    wth_cat = jnp.transpose(wth, (1, 0, 2)).reshape(C, R * A).astype(compute_dtype)
    wph_cat = jnp.transpose(wph, (1, 0, 2)).reshape(Hd, R * A).astype(compute_dtype)
    wg_cat = jnp.transpose(wg, (1, 0, 2)).reshape(Hd, R * A).astype(compute_dtype)
    wo_cat = wo.reshape(R * A, C).astype(compute_dtype)   # contraction == sum over blocks

    w1c = w1.astype(compute_dtype)
    w2c = w2.astype(compute_dtype)
    wc1ac = wc1a.astype(compute_dtype)
    wc1bc = wc1b.astype(compute_dtype)
    wc2c = wc2.astype(compute_dtype)
    # biases / BN stats stay f32 (tiny, added on f32 accumulators)

    # ---- batch blocking: prefer 2 parallel grid steps (v7x has 2 TCs) only when
    #      each step still fills the MXU row dim and stays (8,128)-legal;
    #      otherwise collapse the whole batch into a single step. ----
    bb = B
    if (B % 2 == 0) and ((B // 2) * N >= 128) and (((B // 2) * T) % 8 == 0):
        bb = B // 2
    steps = B // bb

    kernel = functools.partial(_distill_kernel, use_text=use_text,
                               num_rn=R, bb=bb, N=N, T=T, A=A)

    def full(x):
        nd = x.ndim
        return pl.BlockSpec(x.shape, lambda s, _nd=nd: (0,) * _nd)

    grid_spec = pltpu.PrefetchScalarGridSpec(
        num_scalar_prefetch=0,
        grid=(steps,),
        in_specs=[
            pl.BlockSpec((bb * N, C), lambda s: (s, 0)),     # image features
            pl.BlockSpec((bb * T, Hd), lambda s: (s, 0)),    # text tokens
            pl.BlockSpec((bb, Hd), lambda s: (s, 0)),        # averaged text feature
            full(w1c), full(b1), full(w2c), full(b2),
            full(wth_cat), full(wph_cat), full(wg_cat), full(wo_cat),
            full(wc1ac), full(wc1bc), full(bc1),
            full(bn_g), full(bn_b), full(bn_rm), full(bn_rv),
            full(wc2c), full(bc2),
        ],
        out_specs=[
            pl.BlockSpec((bb, n_classes), lambda s: (s, 0)),
            pl.BlockSpec((bb, Hd), lambda s: (s, 0)),
        ],
    )

    out_shape = (jax.ShapeDtypeStruct((B, n_classes), jnp.float32),
                 jax.ShapeDtypeStruct((B, Hd), jnp.float32))

    prob, tloss = pl.pallas_call(
        kernel,
        out_shape=out_shape,
        grid_spec=grid_spec,
        compiler_params=pltpu.CompilerParams(
            dimension_semantics=("parallel",),
            vmem_limit_bytes=32 * 1024 * 1024),
    )(img_flat, txt_flat, avg_txt, w1c, b1, w2c, b2,
      wth_cat, wph_cat, wg_cat, wo_cat, wc1ac, wc1bc, bc1,
      bn_g, bn_b, bn_rm, bn_rv, wc2c, bc2)

    return prob, tloss


def init_params(key, C, Hd, A, R, n_classes):
    Cm = C // 2
    ks = jax.random.split(key, 16)

    def w(k, shape, scale=0.1):
        return jax.random.normal(k, shape, jnp.float32) * scale

    w1 = w(ks[0], (C, Cm));            b1 = w(ks[1], (1, Cm), 0.01)
    w2 = w(ks[2], (Cm, Hd));           b2 = w(ks[3], (1, Hd), 0.01)
    wth = w(ks[4], (R, C, A))
    wph = w(ks[5], (R, Hd, A))
    wg = w(ks[6], (R, Hd, A))
    wo = w(ks[7], (R, A, C))
    wc1a = w(ks[8], (C, C));           wc1b = w(ks[9], (C, C))
    bc1 = w(ks[10], (1, C), 0.01)
    bn_g = 1.0 + w(ks[11], (1, C), 0.05)
    bn_b = w(ks[12], (1, C), 0.05)
    bn_rm = w(ks[13], (1, C), 0.05)
    bn_rv = 1.0 + jnp.abs(w(ks[14], (1, C), 0.05))
    wc2 = w(ks[15], (C, n_classes))
    bc2 = jnp.zeros((1, n_classes), jnp.float32)
    return (w1, b1, w2, b2, wth, wph, wg, wo, wc1a, wc1b, bc1,
            bn_g, bn_b, bn_rm, bn_rv, wc2, bc2)


def reference(img_feat, last_txt_feat, params, use_text=True):
    p = [np.asarray(x, np.float64) for x in params]
    (w1, b1, w2, b2, wth, wph, wg, wo, wc1a, wc1b, bc1,
     bn_g, bn_b, bn_rm, bn_rv, wc2, bc2) = p
    img = np.asarray(img_feat, np.float64)
    txt = np.asarray(last_txt_feat, np.float64)
    B, C, H, W = img.shape
    N = H * W
    augB, Hd = txt.shape
    T = augB // B
    imgv = img.reshape(B, C, N)
    txt_r = txt.reshape(B, T, Hd)
    avg = txt_r.mean(axis=1)
    att_img = imgv.mean(axis=2)
    h1 = att_img @ w1 + b1
    h1 = np.where(h1 > 0, h1, 0.01 * h1)
    tt = np.tanh(h1 @ w2 + b2)
    tloss = (tt - avg) ** 2
    R = wth.shape[0]
    probs = np.zeros((B, wc2.shape[1]))
    for b in range(B):
        tf_rows = txt_r[b] if use_text else tt[b:b + 1]
        acc = np.zeros((C,))
        for i in range(R):
            theta = imgv[b].T @ wth[i]
            phi = tf_rows @ wph[i]
            g = tf_rows @ wg[i]
            s = theta @ phi.T
            s = s - s.max(axis=-1, keepdims=True)
            e = np.exp(s)
            att = e / e.sum(axis=-1, keepdims=True)
            y = att @ g
            out = (y @ wo[i]).T + imgv[b]
            acc = acc + out.mean(axis=1)
        att_ti = acc / R
        z = att_img[b] @ wc1a + att_ti @ wc1b + bc1[0]
        z = (z - bn_rm[0]) / np.sqrt(bn_rv[0] + 1e-5) * bn_g[0] + bn_b[0]
        z = np.maximum(z, 0.0)
        logit = z @ wc2 + bc2[0]
        probs[b] = 1.0 / (1.0 + np.exp(-logit))
    return probs, tloss


if __name__ == "__main__":
    # small shapes consistent with the module: B=2, img_feat_size=32, 8x8 conv grid,
    # hidden_size=32, 4 text tokens per image, attfeat_size=32, num_rn_module=2, 16 classes
    B, C, H, W = 2, 32, 8, 8
    Hd, T, A, R, n_classes = 32, 4, 32, 2, 16

    key = jax.random.PRNGKey(0)
    k_img, k_txt, k_par = jax.random.split(key, 3)
    img_feat = jax.random.normal(k_img, (B, C, H, W), jnp.float32)
    last_txt_feat = jax.random.normal(k_txt, (B * T, Hd), jnp.float32)
    params = init_params(k_par, C, Hd, A, R, n_classes)

    prob, tloss = distill_forward(img_feat, last_txt_feat, params, use_text=True)
    jax.block_until_ready((prob, tloss))

    ref_prob, ref_loss = reference(img_feat, last_txt_feat, params, use_text=True)
    # bf16 activations/weights on the MXU (f32 accumulation) -> bf16-level tolerance
    assert np.allclose(np.asarray(prob), ref_prob, rtol=1e-2, atol=1e-2)
    assert np.allclose(np.asarray(tloss), ref_loss, rtol=1e-2, atol=1e-2)
    print("KERNEL_OK")
</pallas_src>

<mosaic_0001>
module attributes {stable_mosaic.version = 11 : i64} {
  func.func @_distill_kernel(%arg0: i32, %arg1: memref<128x32xbf16, #tpu.memory_space<vmem>>, %arg2: memref<8x32xbf16, #tpu.memory_space<vmem>>, %arg3: memref<2x32xf32, #tpu.memory_space<vmem>>, %arg4: memref<32x16xbf16, #tpu.memory_space<vmem>>, %arg5: memref<1x16xf32, #tpu.memory_space<vmem>>, %arg6: memref<16x32xbf16, #tpu.memory_space<vmem>>, %arg7: memref<1x32xf32, #tpu.memory_space<vmem>>, %arg8: memref<32x64xbf16, #tpu.memory_space<vmem>>, %arg9: memref<32x64xbf16, #tpu.memory_space<vmem>>, %arg10: memref<32x64xbf16, #tpu.memory_space<vmem>>, %arg11: memref<64x32xbf16, #tpu.memory_space<vmem>>, %arg12: memref<32x32xbf16, #tpu.memory_space<vmem>>, %arg13: memref<32x32xbf16, #tpu.memory_space<vmem>>, %arg14: memref<1x32xf32, #tpu.memory_space<vmem>>, %arg15: memref<1x32xf32, #tpu.memory_space<vmem>>, %arg16: memref<1x32xf32, #tpu.memory_space<vmem>>, %arg17: memref<1x32xf32, #tpu.memory_space<vmem>>, %arg18: memref<1x32xf32, #tpu.memory_space<vmem>>, %arg19: memref<32x16xbf16, #tpu.memory_space<vmem>>, %arg20: memref<1x16xf32, #tpu.memory_space<vmem>>, %arg21: memref<2x16xf32, #tpu.memory_space<vmem>>, %arg22: memref<2x32xf32, #tpu.memory_space<vmem>>) attributes {dimension_semantics = [#tpu.dimension_semantics<parallel>], iteration_bounds = array<i64: 1>, scalar_prefetch = 0 : i64, scratch_operands = 0 : i64, tpu.core_type = #tpu.core_type<tc>, window_params = [{transform_indices = @transform_0, window_bounds = array<i64: 128, 32>}, {transform_indices = @transform_1, window_bounds = array<i64: 8, 32>}, {transform_indices = @transform_2, window_bounds = array<i64: 2, 32>}, {pipeline_mode = #tpu.pipeline_mode<synchronous>, transform_indices = @transform_3, window_bounds = array<i64: 32, 16>}, {pipeline_mode = #tpu.pipeline_mode<synchronous>, transform_indices = @transform_4, window_bounds = array<i64: 1, 16>}, {pipeline_mode = #tpu.pipeline_mode<synchronous>, transform_indices = @transform_5, window_bounds = array<i64: 16, 32>}, {pipeline_mode = #tpu.pipeline_mode<synchronous>, transform_indices = @transform_6, window_bounds = array<i64: 1, 32>}, {pipeline_mode = #tpu.pipeline_mode<synchronous>, transform_indices = @transform_7, window_bounds = array<i64: 32, 64>}, {pipeline_mode = #tpu.pipeline_mode<synchronous>, transform_indices = @transform_8, window_bounds = array<i64: 32, 64>}, {pipeline_mode = #tpu.pipeline_mode<synchronous>, transform_indices = @transform_9, window_bounds = array<i64: 32, 64>}, {pipeline_mode = #tpu.pipeline_mode<synchronous>, transform_indices = @transform_10, window_bounds = array<i64: 64, 32>}, {pipeline_mode = #tpu.pipeline_mode<synchronous>, transform_indices = @transform_11, window_bounds = array<i64: 32, 32>}, {pipeline_mode = #tpu.pipeline_mode<synchronous>, transform_indices = @transform_12, window_bounds = array<i64: 32, 32>}, {pipeline_mode = #tpu.pipeline_mode<synchronous>, transform_indices = @transform_13, window_bounds = array<i64: 1, 32>}, {pipeline_mode = #tpu.pipeline_mode<synchronous>, transform_indices = @transform_14, window_bounds = array<i64: 1, 32>}, {pipeline_mode = #tpu.pipeline_mode<synchronous>, transform_indices = @transform_15, window_bounds = array<i64: 1, 32>}, {pipeline_mode = #tpu.pipeline_mode<synchronous>, transform_indices = @transform_16, window_bounds = array<i64: 1, 32>}, {pipeline_mode = #tpu.pipeline_mode<synchronous>, transform_indices = @transform_17, window_bounds = array<i64: 1, 32>}, {pipeline_mode = #tpu.pipeline_mode<synchronous>, transform_indices = @transform_18, window_bounds = array<i64: 32, 16>}, {pipeline_mode = #tpu.pipeline_mode<synchronous>, transform_indices = @transform_19, window_bounds = array<i64: 1, 16>}, {transform_indices = @transform_20, window_bounds = array<i64: 2, 16>}, {transform_indices = @transform_21, window_bounds = array<i64: 2, 32>}]} {
    %c0 = arith.constant 0 : index
    %c0_0 = arith.constant 0 : index
    %0 = vector.load %arg1[%c0, %c0_0] : memref<128x32xbf16, #tpu.memory_space<vmem>>, vector<128x32xbf16>
    %1 = tpu.iota {dimensions = array<i32: 0>} : vector<2x128xi32>
    %2 = tpu.iota {dimensions = array<i32: 1>} : vector<2x128xi32>
    %c64_i32 = arith.constant 64 : i32
    %3 = vector.broadcast %c64_i32 : i32 to vector<2x128xi32>
    %4 = arith.muli %1, %3 : vector<2x128xi32>
    %5 = arith.cmpi sge, %2, %4 : vector<2x128xi32>
    %c1_i32 = arith.constant 1 : i32
    %6 = vector.broadcast %c1_i32 : i32 to vector<2x128xi32>
    %7 = arith.addi %1, %6 : vector<2x128xi32>
    %c64_i32_1 = arith.constant 64 : i32
    %8 = vector.broadcast %c64_i32_1 : i32 to vector<2x128xi32>
    %9 = arith.muli %7, %8 : vector<2x128xi32>
    %10 = arith.cmpi slt, %2, %9 : vector<2x128xi32>
    %11 = arith.andi %5, %10 : vector<2x128xi1>
    %cst = arith.constant 1.562500e-02 : f32
    %cst_2 = arith.constant 0.000000e+00 : f32
    %12 = vector.broadcast %cst : f32 to vector<2x128xf32>
    %13 = vector.broadcast %cst_2 : f32 to vector<2x128xf32>
    %14 = arith.select %11, %12, %13 : vector<2x128xi1>, vector<2x128xf32>
    %15 = arith.extf %0 : vector<128x32xbf16> to vector<128x32xf32>
    %cst_3 = arith.constant dense<0.000000e+00> : vector<2x32xf32>
    %16 = tpu.matmul %14, %15, %cst_3 {dimension_numbers = #tpu.dot_dimension_numbers<[1], [0], [0], [1], [0, 0, 1, 1], [], []>} : vector<2x128xf32>, vector<128x32xf32>, vector<2x32xf32> -> vector<2x32xf32>
    %c0_4 = arith.constant 0 : index
    %c0_5 = arith.constant 0 : index
    %17 = vector.load %arg4[%c0_4, %c0_5] : memref<32x16xbf16, #tpu.memory_space<vmem>>, vector<32x16xbf16>
    %18 = arith.extf %17 : vector<32x16xbf16> to vector<32x16xf32>
    %cst_6 = arith.constant dense<0.000000e+00> : vector<2x16xf32>
    %19 = tpu.matmul %16, %18, %cst_6 {dimension_numbers = #tpu.dot_dimension_numbers<[1], [0], [0], [1], [0, 0, 1, 1], [], []>} : vector<2x32xf32>, vector<32x16xf32>, vector<2x16xf32> -> vector<2x16xf32>
    %c0_7 = arith.constant 0 : index
    %c0_8 = arith.constant 0 : index
    %20 = vector.load %arg5[%c0_7, %c0_8] : memref<1x16xf32, #tpu.memory_space<vmem>>, vector<1x16xf32>
    %21 = vector.broadcast %20 : vector<1x16xf32> to vector<2x16xf32>
    %22 = arith.addf %19, %21 : vector<2x16xf32>
    %cst_9 = arith.constant 0.000000e+00 : f32
    %23 = vector.broadcast %cst_9 : f32 to vector<2x16xf32>
    %24 = arith.cmpf ogt, %22, %23 : vector<2x16xf32>
    %cst_10 = arith.constant 0.00999999977 : f32
    %25 = vector.broadcast %cst_10 : f32 to vector<2x16xf32>
    %26 = arith.mulf %25, %22 : vector<2x16xf32>
    %27 = arith.select %24, %22, %26 : vector<2x16xi1>, vector<2x16xf32>
    %c0_11 = arith.constant 0 : index
    %c0_12 = arith.constant 0 : index
    %28 = vector.load %arg6[%c0_11, %c0_12] : memref<16x32xbf16, #tpu.memory_space<vmem>>, vector<16x32xbf16>
    %29 = arith.extf %28 : vector<16x32xbf16> to vector<16x32xf32>
    %cst_13 = arith.constant dense<0.000000e+00> : vector<2x32xf32>
    %30 = tpu.matmul %27, %29, %cst_13 {dimension_numbers = #tpu.dot_dimension_numbers<[1], [0], [0], [1], [0, 0, 1, 1], [], []>} : vector<2x16xf32>, vector<16x32xf32>, vector<2x32xf32> -> vector<2x32xf32>
    %c0_14 = arith.constant 0 : index
    %c0_15 = arith.constant 0 : index
    %31 = vector.load %arg7[%c0_14, %c0_15] : memref<1x32xf32, #tpu.memory_space<vmem>>, vector<1x32xf32>
    %32 = vector.broadcast %31 : vector<1x32xf32> to vector<2x32xf32>
    %33 = arith.addf %30, %32 : vector<2x32xf32>
    %34 = math.tanh %33 : vector<2x32xf32>
    %c0_16 = arith.constant 0 : index
    %c0_17 = arith.constant 0 : index
    %35 = vector.load %arg3[%c0_16, %c0_17] : memref<2x32xf32, #tpu.memory_space<vmem>>, vector<2x32xf32>
    %36 = arith.subf %34, %35 : vector<2x32xf32>
    %37 = arith.mulf %36, %36 : vector<2x32xf32>
    %c0_18 = arith.constant 0 : index
    %c0_19 = arith.constant 0 : index
    %38 = vector.load %arg22[%c0_18, %c0_19] : memref<2x32xf32, #tpu.memory_space<vmem>>, vector<2x32xf32>
    tpu.vector_store %arg22[%c0_18, %c0_19], %37 {strides = array<i32>} : memref<2x32xf32, #tpu.memory_space<vmem>>, vector<2x32xf32>,
    %c0_20 = arith.constant 0 : index
    %c0_21 = arith.constant 0 : index
    %39 = vector.load %arg2[%c0_20, %c0_21] : memref<8x32xbf16, #tpu.memory_space<vmem>>, vector<8x32xbf16>
    %c0_22 = arith.constant 0 : index
    %c0_23 = arith.constant 0 : index
    %40 = vector.load %arg10[%c0_22, %c0_23] : memref<32x64xbf16, #tpu.memory_space<vmem>>, vector<32x64xbf16>
    %cst_24 = arith.constant dense<0.000000e+00> : vector<8x64xf32>
    %41 = tpu.matmul %39, %40, %cst_24 {dimension_numbers = #tpu.dot_dimension_numbers<[1], [0], [0], [1], [0, 0, 1, 1], [], []>} : vector<8x32xbf16>, vector<32x64xbf16>, vector<8x64xf32> -> vector<8x64xf32>
    %c0_25 = arith.constant 0 : index
    %c0_26 = arith.constant 0 : index
    %42 = vector.load %arg8[%c0_25, %c0_26] : memref<32x64xbf16, #tpu.memory_space<vmem>>, vector<32x64xbf16>
    %cst_27 = arith.constant dense<0.000000e+00> : vector<128x64xf32>
    %43 = tpu.matmul %0, %42, %cst_27 {dimension_numbers = #tpu.dot_dimension_numbers<[1], [0], [0], [1], [0, 0, 1, 1], [], []>} : vector<128x32xbf16>, vector<32x64xbf16>, vector<128x64xf32> -> vector<128x64xf32>
    %c0_28 = arith.constant 0 : index
    %c0_29 = arith.constant 0 : index
    %44 = vector.load %arg9[%c0_28, %c0_29] : memref<32x64xbf16, #tpu.memory_space<vmem>>, vector<32x64xbf16>
    %cst_30 = arith.constant dense<0.000000e+00> : vector<8x64xf32>
    %45 = tpu.matmul %39, %44, %cst_30 {dimension_numbers = #tpu.dot_dimension_numbers<[1], [0], [0], [1], [0, 0, 1, 1], [], []>} : vector<8x32xbf16>, vector<32x64xbf16>, vector<8x64xf32> -> vector<8x64xf32>
    %46 = vector.extract_strided_slice %43 {offsets = [0, 0], sizes = [64, 64], strides = [1, 1]} : vector<128x64xf32> to vector<64x64xf32>
    %47 = vector.extract_strided_slice %45 {offsets = [0, 0], sizes = [4, 64], strides = [1, 1]} : vector<8x64xf32> to vector<4x64xf32>
    %48 = vector.extract_strided_slice %41 {offsets = [0, 0], sizes = [4, 64], strides = [1, 1]} : vector<8x64xf32> to vector<4x64xf32>
    %49 = vector.extract_strided_slice %46 {offsets = [0, 0], sizes = [64, 32], strides = [1, 1]} : vector<64x64xf32> to vector<64x32xf32>
    %50 = vector.extract_strided_slice %47 {offsets = [0, 0], sizes = [4, 32], strides = [1, 1]} : vector<4x64xf32> to vector<4x32xf32>
    %51 = vector.extract_strided_slice %48 {offsets = [0, 0], sizes = [4, 32], strides = [1, 1]} : vector<4x64xf32> to vector<4x32xf32>
    %cst_31 = arith.constant dense<0.000000e+00> : vector<4x64xf32>
    %52 = tpu.matmul %50, %49, %cst_31 {dimension_numbers = #tpu.dot_dimension_numbers<[1], [1], [0], [0], [0, 0, 1, 0], [], []>} : vector<4x32xf32>, vector<64x32xf32>, vector<4x64xf32> -> vector<4x64xf32>
    %cst_32 = arith.constant dense<0xFF800000> : vector<64xf32>
    %53 = vector.multi_reduction <maximumf>, %52, %cst_32 [0] : vector<4x64xf32> to vector<64xf32>
    %54 = vector.shape_cast %53 : vector<64xf32> to vector<1x64xf32>
    %55 = vector.broadcast %54 : vector<1x64xf32> to vector<4x64xf32>
    %56 = arith.subf %52, %55 : vector<4x64xf32>
    %57 = math.exp %56 : vector<4x64xf32>
    %cst_33 = arith.constant dense<0.000000e+00> : vector<64xf32>
    %58 = vector.multi_reduction <add>, %57, %cst_33 [0] : vector<4x64xf32> to vector<64xf32>
    %59 = vector.shape_cast %58 : vector<64xf32> to vector<1x64xf32>
    %60 = vector.broadcast %59 : vector<1x64xf32> to vector<4x64xf32>
    %61 = arith.divf %57, %60 : vector<4x64xf32>
    %cst_34 = arith.constant dense<0.000000e+00> : vector<4xf32>
    %62 = vector.multi_reduction <add>, %61, %cst_34 [1] : vector<4x64xf32> to vector<4xf32>
    %63 = vector.shape_cast %62 : vector<4xf32> to vector<4x1xf32>
    %cst_35 = arith.constant 1.562500e-02 : f32
    %64 = vector.broadcast %cst_35 : f32 to vector<4x1xf32>
    %65 = arith.mulf %63, %64 : vector<4x1xf32>
    %66 = vector.broadcast %65 : vector<4x1xf32> to vector<4x32xf32>
    %67 = arith.mulf %66, %51 : vector<4x32xf32>
    %cst_36 = arith.constant dense<0.000000e+00> : vector<32xf32>
    %68 = vector.multi_reduction <add>, %67, %cst_36 [0] : vector<4x32xf32> to vector<32xf32>
    %69 = vector.shape_cast %68 : vector<32xf32> to vector<1x32xf32>
    %70 = vector.extract_strided_slice %46 {offsets = [0, 32], sizes = [64, 32], strides = [1, 1]} : vector<64x64xf32> to vector<64x32xf32>
    %71 = vector.extract_strided_slice %47 {offsets = [0, 32], sizes = [4, 32], strides = [1, 1]} : vector<4x64xf32> to vector<4x32xf32>
    %72 = vector.extract_strided_slice %48 {offsets = [0, 32], sizes = [4, 32], strides = [1, 1]} : vector<4x64xf32> to vector<4x32xf32>
    %cst_37 = arith.constant dense<0.000000e+00> : vector<4x64xf32>
    %73 = tpu.matmul %71, %70, %cst_37 {dimension_numbers = #tpu.dot_dimension_numbers<[1], [1], [0], [0], [0, 0, 1, 0], [], []>} : vector<4x32xf32>, vector<64x32xf32>, vector<4x64xf32> -> vector<4x64xf32>
    %cst_38 = arith.constant dense<0xFF800000> : vector<64xf32>
    %74 = vector.multi_reduction <maximumf>, %73, %cst_38 [0] : vector<4x64xf32> to vector<64xf32>
    %75 = vector.shape_cast %74 : vector<64xf32> to vector<1x64xf32>
    %76 = vector.broadcast %75 : vector<1x64xf32> to vector<4x64xf32>
    %77 = arith.subf %73, %76 : vector<4x64xf32>
    %78 = math.exp %77 : vector<4x64xf32>
    %cst_39 = arith.constant dense<0.000000e+00> : vector<64xf32>
    %79 = vector.multi_reduction <add>, %78, %cst_39 [0] : vector<4x64xf32> to vector<64xf32>
    %80 = vector.shape_cast %79 : vector<64xf32> to vector<1x64xf32>
    %81 = vector.broadcast %80 : vector<1x64xf32> to vector<4x64xf32>
    %82 = arith.divf %78, %81 : vector<4x64xf32>
    %cst_40 = arith.constant dense<0.000000e+00> : vector<4xf32>
    %83 = vector.multi_reduction <add>, %82, %cst_40 [1] : vector<4x64xf32> to vector<4xf32>
    %84 = vector.shape_cast %83 : vector<4xf32> to vector<4x1xf32>
    %cst_41 = arith.constant 1.562500e-02 : f32
    %85 = vector.broadcast %cst_41 : f32 to vector<4x1xf32>
    %86 = arith.mulf %84, %85 : vector<4x1xf32>
    %87 = vector.broadcast %86 : vector<4x1xf32> to vector<4x32xf32>
    %88 = arith.mulf %87, %72 : vector<4x32xf32>
    %cst_42 = arith.constant dense<0.000000e+00> : vector<32xf32>
    %89 = vector.multi_reduction <add>, %88, %cst_42 [0] : vector<4x32xf32> to vector<32xf32>
    %90 = vector.shape_cast %89 : vector<32xf32> to vector<1x32xf32>
    %91 = tpu.concatenate %69, %90 in 1 : vector<1x32xf32>, vector<1x32xf32> -> vector<1x64xf32>
    %92 = vector.extract_strided_slice %43 {offsets = [64, 0], sizes = [64, 64], strides = [1, 1]} : vector<128x64xf32> to vector<64x64xf32>
    %93 = vector.extract_strided_slice %45 {offsets = [4, 0], sizes = [4, 64], strides = [1, 1]} : vector<8x64xf32> to vector<4x64xf32>
    %94 = vector.extract_strided_slice %41 {offsets = [4, 0], sizes = [4, 64], strides = [1, 1]} : vector<8x64xf32> to vector<4x64xf32>
    %95 = vector.extract_strided_slice %92 {offsets = [0, 0], sizes = [64, 32], strides = [1, 1]} : vector<64x64xf32> to vector<64x32xf32>
    %96 = vector.extract_strided_slice %93 {offsets = [0, 0], sizes = [4, 32], strides = [1, 1]} : vector<4x64xf32> to vector<4x32xf32>
    %97 = vector.extract_strided_slice %94 {offsets = [0, 0], sizes = [4, 32], strides = [1, 1]} : vector<4x64xf32> to vector<4x32xf32>
    %cst_43 = arith.constant dense<0.000000e+00> : vector<4x64xf32>
    %98 = tpu.matmul %96, %95, %cst_43 {dimension_numbers = #tpu.dot_dimension_numbers<[1], [1], [0], [0], [0, 0, 1, 0], [], []>} : vector<4x32xf32>, vector<64x32xf32>, vector<4x64xf32> -> vector<4x64xf32>
    %cst_44 = arith.constant dense<0xFF800000> : vector<64xf32>
    %99 = vector.multi_reduction <maximumf>, %98, %cst_44 [0] : vector<4x64xf32> to vector<64xf32>
    %100 = vector.shape_cast %99 : vector<64xf32> to vector<1x64xf32>
    %101 = vector.broadcast %100 : vector<1x64xf32> to vector<4x64xf32>
    %102 = arith.subf %98, %101 : vector<4x64xf32>
    %103 = math.exp %102 : vector<4x64xf32>
    %cst_45 = arith.constant dense<0.000000e+00> : vector<64xf32>
    %104 = vector.multi_reduction <add>, %103, %cst_45 [0] : vector<4x64xf32> to vector<64xf32>
    %105 = vector.shape_cast %104 : vector<64xf32> to vector<1x64xf32>
    %106 = vector.broadcast %105 : vector<1x64xf32> to vector<4x64xf32>
    %107 = arith.divf %103, %106 : vector<4x64xf32>
    %cst_46 = arith.constant dense<0.000000e+00> : vector<4xf32>
    %108 = vector.multi_reduction <add>, %107, %cst_46 [1] : vector<4x64xf32> to vector<4xf32>
    %109 = vector.shape_cast %108 : vector<4xf32> to vector<4x1xf32>
    %cst_47 = arith.constant 1.562500e-02 : f32
    %110 = vector.broadcast %cst_47 : f32 to vector<4x1xf32>
    %111 = arith.mulf %109, %110 : vector<4x1xf32>
    %112 = vector.broadcast %111 : vector<4x1xf32> to vector<4x32xf32>
    %113 = arith.mulf %112, %97 : vector<4x32xf32>
    %cst_48 = arith.constant dense<0.000000e+00> : vector<32xf32>
    %114 = vector.multi_reduction <add>, %113, %cst_48 [0] : vector<4x32xf32> to vector<32xf32>
    %115 = vector.shape_cast %114 : vector<32xf32> to vector<1x32xf32>
    %116 = vector.extract_strided_slice %92 {offsets = [0, 32], sizes = [64, 32], strides = [1, 1]} : vector<64x64xf32> to vector<64x32xf32>
    %117 = vector.extract_strided_slice %93 {offsets = [0, 32], sizes = [4, 32], strides = [1, 1]} : vector<4x64xf32> to vector<4x32xf32>
    %118 = vector.extract_strided_slice %94 {offsets = [0, 32], sizes = [4, 32], strides = [1, 1]} : vector<4x64xf32> to vector<4x32xf32>
    %cst_49 = arith.constant dense<0.000000e+00> : vector<4x64xf32>
    %119 = tpu.matmul %117, %116, %cst_49 {dimension_numbers = #tpu.dot_dimension_numbers<[1], [1], [0], [0], [0, 0, 1, 0], [], []>} : vector<4x32xf32>, vector<64x32xf32>, vector<4x64xf32> -> vector<4x64xf32>
    %cst_50 = arith.constant dense<0xFF800000> : vector<64xf32>
    %120 = vector.multi_reduction <maximumf>, %119, %cst_50 [0] : vector<4x64xf32> to vector<64xf32>
    %121 = vector.shape_cast %120 : vector<64xf32> to vector<1x64xf32>
    %122 = vector.broadcast %121 : vector<1x64xf32> to vector<4x64xf32>
    %123 = arith.subf %119, %122 : vector<4x64xf32>
    %124 = math.exp %123 : vector<4x64xf32>
    %cst_51 = arith.constant dense<0.000000e+00> : vector<64xf32>
    %125 = vector.multi_reduction <add>, %124, %cst_51 [0] : vector<4x64xf32> to vector<64xf32>
    %126 = vector.shape_cast %125 : vector<64xf32> to vector<1x64xf32>
    %127 = vector.broadcast %126 : vector<1x64xf32> to vector<4x64xf32>
    %128 = arith.divf %124, %127 : vector<4x64xf32>
    %cst_52 = arith.constant dense<0.000000e+00> : vector<4xf32>
    %129 = vector.multi_reduction <add>, %128, %cst_52 [1] : vector<4x64xf32> to vector<4xf32>
    %130 = vector.shape_cast %129 : vector<4xf32> to vector<4x1xf32>
    %cst_53 = arith.constant 1.562500e-02 : f32
    %131 = vector.broadcast %cst_53 : f32 to vector<4x1xf32>
    %132 = arith.mulf %130, %131 : vector<4x1xf32>
    %133 = vector.broadcast %132 : vector<4x1xf32> to vector<4x32xf32>
    %134 = arith.mulf %133, %118 : vector<4x32xf32>
    %cst_54 = arith.constant dense<0.000000e+00> : vector<32xf32>
    %135 = vector.multi_reduction <add>, %134, %cst_54 [0] : vector<4x32xf32> to vector<32xf32>
    %136 = vector.shape_cast %135 : vector<32xf32> to vector<1x32xf32>
    %137 = tpu.concatenate %115, %136 in 1 : vector<1x32xf32>, vector<1x32xf32> -> vector<1x64xf32>
    %138 = tpu.concatenate %91, %137 in 0 : vector<1x64xf32>, vector<1x64xf32> -> vector<2x64xf32>
    %c0_55 = arith.constant 0 : index
    %c0_56 = arith.constant 0 : index
    %139 = vector.load %arg11[%c0_55, %c0_56] : memref<64x32xbf16, #tpu.memory_space<vmem>>, vector<64x32xbf16>
    %140 = arith.extf %139 : vector<64x32xbf16> to vector<64x32xf32>
    %cst_57 = arith.constant dense<0.000000e+00> : vector<2x32xf32>
    %141 = tpu.matmul %138, %140, %cst_57 {dimension_numbers = #tpu.dot_dimension_numbers<[1], [0], [0], [1], [0, 0, 1, 1], [], []>} : vector<2x64xf32>, vector<64x32xf32>, vector<2x32xf32> -> vector<2x32xf32>
    %cst_58 = arith.constant 5.000000e-01 : f32
    %142 = vector.broadcast %cst_58 : f32 to vector<2x32xf32>
    %143 = arith.mulf %141, %142 : vector<2x32xf32>
    %144 = arith.addf %143, %16 : vector<2x32xf32>
    %c0_59 = arith.constant 0 : index
    %c0_60 = arith.constant 0 : index
    %145 = vector.load %arg12[%c0_59, %c0_60] : memref<32x32xbf16, #tpu.memory_space<vmem>>, vector<32x32xbf16>
    %146 = arith.extf %145 : vector<32x32xbf16> to vector<32x32xf32>
    %cst_61 = arith.constant dense<0.000000e+00> : vector<2x32xf32>
    %147 = tpu.matmul %16, %146, %cst_61 {dimension_numbers = #tpu.dot_dimension_numbers<[1], [0], [0], [1], [0, 0, 1, 1], [], []>} : vector<2x32xf32>, vector<32x32xf32>, vector<2x32xf32> -> vector<2x32xf32>
    %c0_62 = arith.constant 0 : index
    %c0_63 = arith.constant 0 : index
    %148 = vector.load %arg13[%c0_62, %c0_63] : memref<32x32xbf16, #tpu.memory_space<vmem>>, vector<32x32xbf16>
    %149 = arith.extf %148 : vector<32x32xbf16> to vector<32x32xf32>
    %cst_64 = arith.constant dense<0.000000e+00> : vector<2x32xf32>
    %150 = tpu.matmul %144, %149, %cst_64 {dimension_numbers = #tpu.dot_dimension_numbers<[1], [0], [0], [1], [0, 0, 1, 1], [], []>} : vector<2x32xf32>, vector<32x32xf32>, vector<2x32xf32> -> vector<2x32xf32>
    %151 = arith.addf %147, %150 : vector<2x32xf32>
    %c0_65 = arith.constant 0 : index
    %c0_66 = arith.constant 0 : index
    %152 = vector.load %arg14[%c0_65, %c0_66] : memref<1x32xf32, #tpu.memory_space<vmem>>, vector<1x32xf32>
    %153 = vector.broadcast %152 : vector<1x32xf32> to vector<2x32xf32>
    %154 = arith.addf %151, %153 : vector<2x32xf32>
    %c0_67 = arith.constant 0 : index
    %c0_68 = arith.constant 0 : index
    %155 = vector.load %arg17[%c0_67, %c0_68] : memref<1x32xf32, #tpu.memory_space<vmem>>, vector<1x32xf32>
    %156 = vector.broadcast %155 : vector<1x32xf32> to vector<2x32xf32>
    %157 = arith.subf %154, %156 : vector<2x32xf32>
    %c0_69 = arith.constant 0 : index
    %c0_70 = arith.constant 0 : index
    %158 = vector.load %arg18[%c0_69, %c0_70] : memref<1x32xf32, #tpu.memory_space<vmem>>, vector<1x32xf32>
    %cst_71 = arith.constant 9.99999974E-6 : f32
    %159 = vector.broadcast %cst_71 : f32 to vector<1x32xf32>
    %160 = arith.addf %158, %159 : vector<1x32xf32>
    %161 = math.rsqrt %160 : vector<1x32xf32>
    %162 = vector.broadcast %161 : vector<1x32xf32> to vector<2x32xf32>
    %163 = arith.mulf %157, %162 : vector<2x32xf32>
    %c0_72 = arith.constant 0 : index
    %c0_73 = arith.constant 0 : index
    %164 = vector.load %arg15[%c0_72, %c0_73] : memref<1x32xf32, #tpu.memory_space<vmem>>, vector<1x32xf32>
    %165 = vector.broadcast %164 : vector<1x32xf32> to vector<2x32xf32>
    %166 = arith.mulf %163, %165 : vector<2x32xf32>
    %c0_74 = arith.constant 0 : index
    %c0_75 = arith.constant 0 : index
    %167 = vector.load %arg16[%c0_74, %c0_75] : memref<1x32xf32, #tpu.memory_space<vmem>>, vector<1x32xf32>
    %168 = vector.broadcast %167 : vector<1x32xf32> to vector<2x32xf32>
    %169 = arith.addf %166, %168 : vector<2x32xf32>
    %cst_76 = arith.constant 0.000000e+00 : f32
    %170 = vector.broadcast %cst_76 : f32 to vector<2x32xf32>
    %171 = arith.maximumf %169, %170 : vector<2x32xf32>
    %c0_77 = arith.constant 0 : index
    %c0_78 = arith.constant 0 : index
    %172 = vector.load %arg19[%c0_77, %c0_78] : memref<32x16xbf16, #tpu.memory_space<vmem>>, vector<32x16xbf16>
    %173 = arith.extf %172 : vector<32x16xbf16> to vector<32x16xf32>
    %cst_79 = arith.constant dense<0.000000e+00> : vector<2x16xf32>
    %174 = tpu.matmul %171, %173, %cst_79 {dimension_numbers = #tpu.dot_dimension_numbers<[1], [0], [0], [1], [0, 0, 1, 1], [], []>} : vector<2x32xf32>, vector<32x16xf32>, vector<2x16xf32> -> vector<2x16xf32>
    %c0_80 = arith.constant 0 : index
    %c0_81 = arith.constant 0 : index
    %175 = vector.load %arg20[%c0_80, %c0_81] : memref<1x16xf32, #tpu.memory_space<vmem>>, vector<1x16xf32>
    %176 = vector.broadcast %175 : vector<1x16xf32> to vector<2x16xf32>
    %177 = arith.addf %174, %176 : vector<2x16xf32>
    %178 = arith.negf %177 : vector<2x16xf32>
    %179 = math.exp %178 : vector<2x16xf32>
    %cst_82 = arith.constant 1.000000e+00 : f32
    %180 = vector.broadcast %cst_82 : f32 to vector<2x16xf32>
    %181 = arith.addf %180, %179 : vector<2x16xf32>
    %182 = arith.divf %180, %181 : vector<2x16xf32>
    %c0_83 = arith.constant 0 : index
    %c0_84 = arith.constant 0 : index
    %183 = vector.load %arg21[%c0_83, %c0_84] : memref<2x16xf32, #tpu.memory_space<vmem>>, vector<2x16xf32>
    tpu.vector_store %arg21[%c0_83, %c0_84], %182 {strides = array<i32>} : memref<2x16xf32, #tpu.memory_space<vmem>>, vector<2x16xf32>,
    return
  }
  func.func @transform_0(%arg0: i32) -> (i32, i32) {
    %c0_i32 = arith.constant 0 : i32
    %c0_i32_0 = arith.constant 0 : i32
    return %arg0, %c0_i32 : i32, i32
  }
  func.func @transform_1(%arg0: i32) -> (i32, i32) {
    %c0_i32 = arith.constant 0 : i32
    %c0_i32_0 = arith.constant 0 : i32
    return %arg0, %c0_i32 : i32, i32
  }
  func.func @transform_2(%arg0: i32) -> (i32, i32) {
    %c0_i32 = arith.constant 0 : i32
    %c0_i32_0 = arith.constant 0 : i32
    return %arg0, %c0_i32 : i32, i32
  }
  func.func @transform_3(%arg0: i32) -> (i32, i32) {
    %c0_i32 = arith.constant 0 : i32
    %c0_i32_0 = arith.constant 0 : i32
    %c0_i32_1 = arith.constant 0 : i32
    return %c0_i32, %c0_i32_0 : i32, i32
  }
  func.func @transform_4(%arg0: i32) -> (i32, i32) {
    %c0_i32 = arith.constant 0 : i32
    %c0_i32_0 = arith.constant 0 : i32
    %c0_i32_1 = arith.constant 0 : i32
    return %c0_i32, %c0_i32_0 : i32, i32
  }
  func.func @transform_5(%arg0: i32) -> (i32, i32) {
    %c0_i32 = arith.constant 0 : i32
    %c0_i32_0 = arith.constant 0 : i32
    %c0_i32_1 = arith.constant 0 : i32
    return %c0_i32, %c0_i32_0 : i32, i32
  }
  func.func @transform_6(%arg0: i32) -> (i32, i32) {
    %c0_i32 = arith.constant 0 : i32
    %c0_i32_0 = arith.constant 0 : i32
    %c0_i32_1 = arith.constant 0 : i32
    return %c0_i32, %c0_i32_0 : i32, i32
  }
  func.func @transform_7(%arg0: i32) -> (i32, i32) {
    %c0_i32 = arith.constant 0 : i32
    %c0_i32_0 = arith.constant 0 : i32
    %c0_i32_1 = arith.constant 0 : i32
    return %c0_i32, %c0_i32_0 : i32, i32
  }
  func.func @transform_8(%arg0: i32) -> (i32, i32) {
    %c0_i32 = arith.constant 0 : i32
    %c0_i32_0 = arith.constant 0 : i32
    %c0_i32_1 = arith.constant 0 : i32
    return %c0_i32, %c0_i32_0 : i32, i32
  }
  func.func @transform_9(%arg0: i32) -> (i32, i32) {
    %c0_i32 = arith.constant 0 : i32
    %c0_i32_0 = arith.constant 0 : i32
    %c0_i32_1 = arith.constant 0 : i32
    return %c0_i32, %c0_i32_0 : i32, i32
  }
  func.func @transform_10(%arg0: i32) -> (i32, i32) {
    %c0_i32 = arith.constant 0 : i32
    %c0_i32_0 = arith.constant 0 : i32
    %c0_i32_1 = arith.constant 0 : i32
    return %c0_i32, %c0_i32_0 : i32, i32
  }
  func.func @transform_11(%arg0: i32) -> (i32, i32) {
    %c0_i32 = arith.constant 0 : i32
    %c0_i32_0 = arith.constant 0 : i32
    %c0_i32_1 = arith.constant 0 : i32
    return %c0_i32, %c0_i32_0 : i32, i32
  }
  func.func @transform_12(%arg0: i32) -> (i32, i32) {
    %c0_i32 = arith.constant 0 : i32
    %c0_i32_0 = arith.constant 0 : i32
    %c0_i32_1 = arith.constant 0 : i32
    return %c0_i32, %c0_i32_0 : i32, i32
  }
  func.func @transform_13(%arg0: i32) -> (i32, i32) {
    %c0_i32 = arith.constant 0 : i32
    %c0_i32_0 = arith.constant 0 : i32
    %c0_i32_1 = arith.constant 0 : i32
    return %c0_i32, %c0_i32_0 : i32, i32
  }
  func.func @transform_14(%arg0: i32) -> (i32, i32) {
    %c0_i32 = arith.constant 0 : i32
    %c0_i32_0 = arith.constant 0 : i32
    %c0_i32_1 = arith.constant 0 : i32
    return %c0_i32, %c0_i32_0 : i32, i32
  }
  func.func @transform_15(%arg0: i32) -> (i32, i32) {
    %c0_i32 = arith.constant 0 : i32
    %c0_i32_0 = arith.constant 0 : i32
    %c0_i32_1 = arith.constant 0 : i32
    return %c0_i32, %c0_i32_0 : i32, i32
  }
  func.func @transform_16(%arg0: i32) -> (i32, i32) {
    %c0_i32 = arith.constant 0 : i32
    %c0_i32_0 = arith.constant 0 : i32
    %c0_i32_1 = arith.constant 0 : i32
    return %c0_i32, %c0_i32_0 : i32, i32
  }
  func.func @transform_17(%arg0: i32) -> (i32, i32) {
    %c0_i32 = arith.constant 0 : i32
    %c0_i32_0 = arith.constant 0 : i32
    %c0_i32_1 = arith.constant 0 : i32
    return %c0_i32, %c0_i32_0 : i32, i32
  }
  func.func @transform_18(%arg0: i32) -> (i32, i32) {
    %c0_i32 = arith.constant 0 : i32
    %c0_i32_0 = arith.constant 0 : i32
    %c0_i32_1 = arith.constant 0 : i32
    return %c0_i32, %c0_i32_0 : i32, i32
  }
  func.func @transform_19(%arg0: i32) -> (i32, i32) {
    %c0_i32 = arith.constant 0 : i32
    %c0_i32_0 = arith.constant 0 : i32
    %c0_i32_1 = arith.constant 0 : i32
    return %c0_i32, %c0_i32_0 : i32, i32
  }
  func.func @transform_20(%arg0: i32) -> (i32, i32) {
    %c0_i32 = arith.constant 0 : i32
    %c0_i32_0 = arith.constant 0 : i32
    return %arg0, %c0_i32 : i32, i32
  }
  func.func @transform_21(%arg0: i32) -> (i32, i32) {
    %c0_i32 = arith.constant 0 : i32
    %c0_i32_0 = arith.constant 0 : i32
    return %arg0, %c0_i32 : i32, i32
  }
}

</mosaic_0001>

<bundles_post_ra>
// kernel: tpu_custom_call.1
= control target key start
LH: loop header
LB: loop body
LE: loop exit
PB: predicated region body
PF: predicated region fallthrough
CT: control target
= control target key end

     0   :  { %s2668_s0 = inlined_call_operand.vmem [shape: bf16[128,32], index: 0, kind: input, shape index: {}]   ;;  %s2669_s1 = inlined_call_operand.vmem [shape: bf16[8,32], index: 1, kind: input, shape index: {}]   ;;  %s2670_s2 = inlined_call_operand.vmem [shape: f32[2,32], index: 2, kind: input, shape index: {}]   ;;  %s2671_s3 = inlined_call_operand.vmem [shape: bf16[32,16], index: 3, kind: input, shape index: {}]   ;;  %s2672_s4 = inlined_call_operand.vmem [shape: f32[1,16], index: 4, kind: input, shape index: {}]   ;;  %s2673_s5 = inlined_call_operand.vmem [shape: bf16[16,32], index: 5, kind: input, shape index: {}]   ;;  %s2674_s6 = inlined_call_operand.vmem [shape: f32[1,32], index: 6, kind: input, shape index: {}]   ;;  %s2675_s7 = inlined_call_operand.vmem [shape: bf16[32,64], index: 7, kind: input, shape index: {}]   ;;  %s2676_s8 = inlined_call_operand.vmem [shape: bf16[32,64], index: 8, kind: input, shape index: {}]   ;;  %s2677_s9 = inlined_call_operand.vmem [shape: bf16[32,64], index: 9, kind: input, shape index: {}]   ;;  %s2678_s10 = inlined_call_operand.vmem [shape: bf16[64,32], index: 10, kind: input, shape index: {}]   ;;  %s2679_s11 = inlined_call_operand.vmem [shape: bf16[32,32], index: 11, kind: input, shape index: {}]   ;;  %s2680_s12 = inlined_call_operand.vmem [shape: bf16[32,32], index: 12, kind: input, shape index: {}]   ;;  %s2681_s13 = inlined_call_operand.vmem [shape: f32[1,32], index: 13, kind: input, shape index: {}]   ;;  %s2682_s14 = inlined_call_operand.vmem [shape: f32[1,32], index: 14, kind: input, shape index: {}]   ;;  %s2683_s15 = inlined_call_operand.vmem [shape: f32[1,32], index: 15, kind: input, shape index: {}]   ;;  %s2684_s16 = inlined_call_operand.vmem [shape: f32[1,32], index: 16, kind: input, shape index: {}]   ;;  %s2685_s17 = inlined_call_operand.vmem [shape: f32[1,32], index: 17, kind: input, shape index: {}]   ;;  %s2686_s18 = inlined_call_operand.vmem [shape: bf16[32,16], index: 18, kind: input, shape index: {}]   ;;  %s2687_s19 = inlined_call_operand.vmem [shape: f32[1,16], index: 19, kind: input, shape index: {}]   ;;  %s2688_s20 = inlined_call_operand.hbm [shape: f32[2,16], index: 20, kind: output, shape index: {0}]   ;;  %s2689_s21 = inlined_call_operand.hbm [shape: f32[2,32], index: 21, kind: output, shape index: {1}]  }
   0x1   :  { %2692 = sst [smem:[#allocation8_spill]] %s2668_s0 }
   0x2   :  { %2693 = sst [smem:[#allocation9_spill]] %s2669_s1 }
   0x3   :  { %2694 = sst [smem:[#allocation10_spill]] %s2670_s2 }
   0x4   :  { %2695 = sst [smem:[#allocation11_spill]] %s2671_s3 }
   0x5   :  { %2696 = sst [smem:[#allocation12_spill]] %s2672_s4 }
   0x6   :  { %2697 = sst [smem:[#allocation13_spill]] %s2673_s5 }
   0x7   :  { %27 = vsyncpa [#allocation3], 0  ;;  %s2698_s26 = sld [smem:[#allocation8_spill]]  ;;  %v2176_v2 = vmov 0.0   ;;  %vm2177_vm0 = vmmov 0  }
   0x8   :  { %1862 = vmatprep.subr.mxu0 %v2176_v2  ;;  %1894 = vmatprep.mubr.msk.f32.mxu0 %vm2177_vm0, %v2176_v2  ;;  %s2699_s30 = sld [smem:[#allocation11_spill]] }
   0x9   :  { %1897 = vmatprep.subr.mxu1 %v2176_v2  ;;  %1905 = vmatprep.mubr.msk.f32.mxu1 %vm2177_vm0, %v2176_v2 }
   0xd   :  { %v2296_v0 = vld [vmem:[%s2698_s26 + $0x38] sm:$0xff]   ;;  %v2301_v1 = vld [vmem:[%s2698_s26 + $0x30] sm:$0xff]   ;;  %v2311_v5 = vld [vmem:[%s2698_s26 + $0x28] sm:$0xff]  }
   0xe   :  { %v112_v3 = vunpack.c.h.bf16 %v2296_v0  ;;  %v111_v4 = vunpack.c.l.bf16 %v2296_v0  ;;  %v110_v6 = vunpack.c.h.bf16 %v2301_v1  ;;  %v1754_v7 = vld [vmem:[%s2699_s30 + $0x8] sm:$0xff]   ;;  %v2324_v8 = vld [vmem:[%s2699_s30] sm:$0xff]   ;;  %v109_v9 = vunpack.c.l.bf16 %v2301_v1 }
   0xf   :  { %v108_v10 = vunpack.c.h.bf16 %v2311_v5  ;;  %v1708_v11 = vunpack.c.l.bf16 %v1754_v7  ;;  %v1709_v12 = vunpack.c.h.bf16 %v1754_v7 }
  0x10   :  { %1863 = vmatpush3.msra.mxu0 %v112_v3 }
  0x11   :  { %1864 = vmatprep.subr.mxu0 %v2176_v2 }
  0x12   :  { %1865 = vmatpush3.msra.mxu0 %v111_v4 }
  0x13   :  { %1866 = vmatprep.subr.mxu0 %v2176_v2 }
  0x14   :  { %1867 = vmatpush3.msra.mxu0 %v110_v6 }
  0x15   :  { %28 = vsyncpa [#allocation5], 0  ;;  %1868 = vmatprep.subr.mxu0 %v2176_v2  ;;  %v2333_v13 = vld [vmem:[%s2698_s26 + $0x20] sm:$0xff]   ;;  %v107_v14 = vunpack.c.l.bf16 %v2311_v5  ;;  %1898 = vmatpush3.msra.mxu1 %v1709_v12  ;;  %v1705_v15 = vunpack.c.h.bf16 %v2324_v8  ;;  %v2344_v17 = vld [vmem:[%s2698_s26 + $0x18] sm:$0xff]   ;;  %v86_v18 = vlaneseq  ;;  %v2178_v36 = vmov 0.015625   ;;  %s2700_s30 = sld [smem:[#allocation13_spill]] }
  0x16   :  { %1869 = vmatpush3.msra.mxu0 %v109_v9  ;;  %1899 = vmatprep.subr.mxu1 %v2176_v2  ;;  %v106_v16 = vunpack.c.h.bf16 %v2333_v13  ;;  %v105_v19 = vunpack.c.l.bf16 %v2333_v13  ;;  %v104_v20 = vunpack.c.h.bf16 %v2344_v17  ;;  %v2355_v21 = vld [vmem:[%s2698_s26 + $0x10] sm:$0xff]   ;;  %v103_v23 = vunpack.c.l.bf16 %v2344_v17  ;;  %v2366_v25 = vld [vmem:[%s2698_s26 + $0x8] sm:$0xff]   ;;  %v2376_v29 = vld [vmem:[%s2698_s26] sm:$0xff]   ;;  %s2701_s25 = sld [smem:[#allocation9_spill]]  ;;  %s2180_s4 = smov 32  }
  0x17   :  { %1870 = vmatprep.subr.mxu0 %v2176_v2  ;;  %1900 = vmatpush3.msra.mxu1 %v1708_v11  ;;  %v2357_v22 = vshrl.u32 %v86_v18, 7  ;;  %v102_v24 = vunpack.c.h.bf16 %v2355_v21  ;;  %v101_v27 = vunpack.c.l.bf16 %v2355_v21  ;;  %v100_v28 = vunpack.c.h.bf16 %v2366_v25  ;;  %v2098_v43 = vld [vmem:[%s2676_s8 + $0x8] sm:$0xff]   ;;  %v2099_v44 = vld [vmem:[%s2676_s8] sm:$0xff]   ;;  %s2702_s28 = sld [smem:[#allocation12_spill]] }
  0x18   :  { %1871 = vmatpush3.msra.mxu0 %v108_v10  ;;  %1901 = vmatprep.subr.mxu1 %v2176_v2  ;;  %v89_v30 = vand.u32 127, %v86_v18  ;;  %v99_v33 = vunpack.c.l.bf16 %v2366_v25  ;;  %v98_v34 = vunpack.c.h.bf16 %v2376_v29  ;;  %v97_v35 = vunpack.c.l.bf16 %v2376_v29  ;;  %v2094_v51 = vld [vmem:[%s2677_s9 + $0x8] sm:$0xff]   ;;  %v2095_v53 = vld [vmem:[%s2677_s9] sm:$0xff]   ;;  %s2703_s24 = sld [smem:[#allocation10_spill]] }
  0x19   :  { %1872 = vmatprep.subr.mxu0 %v2176_v2  ;;  %1902 = vmatpush3.msra.mxu1 %v1705_v15  ;;  %v92_v26 = vadd.s32 1, %v2357_v22  ;;  %v90_v31 = vmul.u32 64, %v2357_v22  ;;  %v1704_v37 = vunpack.c.l.bf16 %v2324_v8  ;;  %vm198_vm4 = vcmask 261120   ;;  %v2096_v54 = vld [vmem:[%s2675_s7 + $0x8] sm:$0xff]   ;;  %v2097_v55 = vld [vmem:[%s2675_s7] sm:$0xff]  }
  0x1a   :  { %1873 = vmatpush3.msra.mxu0 %v107_v14  ;;  %1903 = vmatprep.subr.mxu1 %v2176_v2  ;;  %vm286_vm6 = vcmask 130048   ;;  %v1630_v60 = vld [vmem:[%s2674_s6] ss:$0 sm:$0xff]  ;;  %vm364_vm7 = vcmask 254976   ;;  %s2179_s6 = smov 96   ;;  %vm756_vm8 = vcmask 519168  }
  0x1b   :  { %1874 = vmatprep.subr.mxu0 %v2176_v2  ;;  %v93_v32 = vmul.u32 64, %v92_v26  ;;  %vm91_vm1 = vcmp.ge.s32.totalorder %v89_v30, %v90_v31  ;;  %1904 = vmatpush3.msra.mxu1 %v1704_v37  ;;  %v1711_v40 = vld [vmem:[%s2700_s30] sm:$0xff]   ;;  %vm781_vm9 = vcmask 257024   ;;  %vm919_vm10 = vcmask 519424  }
  0x1c   :  { %1875 = vmatpush3.msra.mxu0 %v106_v16  ;;  %1908 = vmatprep.subr.mxu1 %v2176_v2  ;;  %v1713_v41 = vunpack.c.h.bf16 %v1711_v40  ;;  %v1712_v42 = vunpack.c.l.bf16 %v1711_v40  ;;  %v366_v45 = vld [vmem:[%s2701_s25] sm:$0xf]  ;;  %vm1207_vm11 = vcmask 1040384   ;;  %vm1225_vm12 = vcmask 523264  }
  0x1d   :  { %1876 = vmatprep.subr.mxu0 %v2176_v2  ;;  %vm94_vm2 = vcmp.lt.s32.totalorder %v89_v30, %v93_v32  ;;  %v1628_v46 = vld [vmem:[%s2702_s28] ss:$0 sm:$0xff] }
  0x1e   :  { %1877 = vmatpush3.msra.mxu0 %v105_v19  ;;  %vm95_vm3 = vmand %vm91_vm1, %vm94_vm2 }
  0x1f   :  { %1878 = vmatprep.subr.mxu0 %v2176_v2 }
  0x20   :  { %1879 = vmatpush3.msra.mxu0 %v104_v20 }
  0x21   :  { %1880 = vmatprep.subr.mxu0 %v2176_v2 }
  0x22   :  { %1881 = vmatpush3.msra.mxu0 %v103_v23 }
  0x23   :  { %1882 = vmatprep.subr.mxu0 %v2176_v2 }
  0x24   :  { %1883 = vmatpush3.msra.mxu0 %v102_v24 }
  0x25   :  { %1884 = vmatprep.subr.mxu0 %v2176_v2 }
  0x26   :  { %1885 = vmatpush3.msra.mxu0 %v101_v27 }
  0x27   :  { %1886 = vmatprep.subr.mxu0 %v2176_v2 }
  0x28   :  { %1887 = vmatpush3.msra.mxu0 %v100_v28 }
  0x29   :  { %1888 = vmatprep.subr.mxu0 %v2176_v2 }
  0x2a   :  { %1889 = vmatpush3.msra.mxu0 %v99_v33 }
  0x2b   :  { %1890 = vmatprep.subr.mxu0 %v2176_v2 }
  0x2c   :  { %1891 = vmatpush3.msra.mxu0 %v98_v34 }
  0x2d   :  { %1892 = vmatprep.subr.mxu0 %v2176_v2 }
  0x2e   :  { %1893 = vmatpush3.msra.mxu0 %v97_v35 }
  0x2f   :  { %1895 = vmatmul.mubr.msk.f32.vlgmr.msra.gmra.mxu0 %vm95_vm3, %v2178_v36  ;;  %1943 = vmatprep.subr.bf16.mxu0 %v2176_v2 }
  0x30   :  { %1947 = vmatprep.mubr.msk.bf16.mxu0 %vm2177_vm0, %v2176_v2  ;;  %1944 = vmatpush3.bf16.msra.mxu0 %v2098_v43 }
  0x31   :  { %1945 = vmatprep.subr.bf16.mxu0 %v2176_v2 }
  0x34   :  { %1946 = vmatpush3.bf16.msra.mxu0 %v2099_v44 }
  0x35   :  { %1970 = vmatprep.subr.mxu0 %v2176_v2 }
  0x37   :  { %1948 = vmatmul.mubr.msk.bf16.vlgmr.msra.gmra.mxu0 %vm198_vm4, %v366_v45 }
  0x38   :  { %1986 = vmatprep.mubr.msk.f32.mxu0 %vm2177_vm0, %v2176_v2 }
  0xef   :  { %v2391_v38 = vpop.f32.mrf.mxu0 }
  0xf0   :  { %1906 = vmatmul.mubr.msk.f32.vlgmr.msra.gmra.mxu1 %vm198_vm4, %v2391_v38 }
  0xf1   :  { %v1896_v39 = vpop.f32.mrf.mxu0  ;;  %1912 = vmatprep.mubr.msk.f32.mxu1 %vm2177_vm0, %v2176_v2  ;;  %1909 = vmatpush3.msra.mxu1 %v1713_v41 }
  0xf2   :  { %1910 = vmatprep.subr.mxu1 %v2176_v2 }
  0xf3   :  { %1911 = vmatpush3.msra.mxu1 %v1712_v42 }
  0xf4   :  { %1915 = vmatprep.subr.bf16.mxu1 %v2176_v2 }
  0xf7   :  { %v2454_v56 = vpop.f32.mrf.mxu0 }
  0xf8   :  { %v928_v26 = vrot.slane %v2454_v56, 4 }
  0xf9   :  { %v1949_v57 = vpop.f32.mrf.mxu0 }
  0xfb   :  { %v656_v58 = vpop.f32.mrf.mxu0 }
  0xfd   :  { %v1950_v59 = vpop.f32.mrf.mxu0 }
 0x1b0   :  { %v268_v47 = vpop.f32.mrf.mxu1 }
 0x1b1   :  { %v269_v48 = vadd.f32 %v1628_v46, %v268_v47 }
 0x1b2   :  { %v1907_v49 = vpop.f32.mrf.mxu1 }
 0x1b3   :  { %vm272_vm5 = vcmp.gt.f32.partialorder %v269_v48, 0.0  ;;  %v273_v50 = vmul.f32 0.01, %v269_v48 }
 0x1b5   :  { %v274_v52 = vsel %vm272_vm5, %v269_v48, %v273_v50 }
 0x1b6   :  { %1913 = vmatmul.mubr.msk.f32.vlgmr.msra.gmra.mxu1 %vm286_vm6, %v274_v52 }
 0x1b7   :  { %1916 = vmatpush3.bf16.msra.mxu1 %v2094_v51  ;;  %1919 = vmatprep.mubr.msk.bf16.mxu1 %vm2177_vm0, %v2176_v2 }
 0x1b8   :  { %1917 = vmatprep.subr.bf16.mxu1 %v2176_v2 }
 0x1bb   :  { %1918 = vmatpush3.bf16.msra.mxu1 %v2095_v53 }
 0x1bc   :  { %1923 = vmatprep.subr.bf16.mxu1 %v2096_v54 }
 0x1be   :  { %1920 = vmatmul.mubr.msk.bf16.vlgmr.msra.gmra.mxu1 %vm198_vm4, %v366_v45 }
 0x1bf   :  { %1924 = vmatpush3.bf16.msra.mxu1 %v2096_v54  ;;  %1927 = vmatprep.mubr.msk.bf16.mxu1 %vm198_vm4, %v2376_v29 }
 0x1c0   :  { %1925 = vmatprep.subr.bf16.mxu1 %v2097_v55 }
 0x1c3   :  { %1926 = vmatpush3.bf16.msra.mxu1 %v2097_v55 }
 0x1c4   :  { %1951 = vmatprep.subr.mxu1 %v2176_v2 }
 0x1c6   :  { %1928 = vmatmul.mubr.msk.bf16.vlgmr.msra.gmra.mxu1 %vm198_vm4, %v2366_v25 }
 0x1c7   :  { %1931 = vmatprep.mubr.msk.bf16.mxu1 %vm198_vm4, %v2355_v21 }
 0x1ce   :  { %1932 = vmatmul.mubr.msk.bf16.gmra.mxu1 %vm198_vm4, %v2344_v17 }
 0x1cf   :  { %1935 = vmatprep.mubr.msk.bf16.mxu1 %vm198_vm4, %v2333_v13 }
 0x1d6   :  { %1936 = vmatmul.mubr.msk.bf16.gmra.mxu1 %vm198_vm4, %v2311_v5  ;;  %v361_v5 = vld [vmem:[%s2703_s24] sm:$0x3] }
 0x1d7   :  { %1939 = vmatprep.mubr.msk.bf16.mxu1 %vm198_vm4, %v2301_v1 }
 0x1de   :  { %1940 = vmatmul.mubr.msk.bf16.gmra.mxu1 %vm198_vm4, %v2296_v0 }
 0x1df   :  { %1967 = vmatprep.mubr.msk.f32.mxu1 %vm2177_vm0, %v2176_v2 }
 0x276   :  { %v356_v61 = vpop.f32.mrf.mxu1 }
 0x277   :  { %v357_v62 = vadd.f32 %v1630_v60, %v356_v61 }
 0x278   :  { %v1914_v63 = vpop.f32.mrf.mxu1 }
 0x279   :  { %2108 = vtanh.f32 %v357_v62 }
 0x27e   :  { %v2459_v1 = vpop.f32.mrf.mxu1 }
 0x27f   :  { %v1049_v27 = vrot.slane %v2459_v1, 4 }
 0x280   :  { %v1921_v3 = vpop.f32.mrf.mxu1 }
 0x282   :  { %v423_v0 = vpop.f32.mrf.mxu1 }
 0x284   :  { %v1922_v4 = vpop.f32.mrf.mxu1 }
 0x286   :  { %v2109_v6 = vpop.eup %2108  ;;  %v1929_v7 = vpop.f32.mrf.mxu1 }
 0x287   :  { %v362_v8 = vsub.f32 %v2109_v6, %v361_v5 }
 0x288   :  { %v540_v9 = vpop.f32.mrf.mxu1 }
 0x289   :  { %v363_v10 = vmul.f32 %v362_v8, %v362_v8 }
 0x28a   :  { %v1930_v11 = vpop.f32.mrf.mxu1 }
 0x28b   :  { %365 = vst.msk [vmem:[#allocation4] sm:$0x3] %vm364_vm7, %v363_v10 }
 0x28c   :  { %v543_v12 = vpop.f32.mrf.mxu1 }
 0x28e   :  { %v1933_v13 = vpop.f32.mrf.mxu1 }
 0x290   :  { %v556_v14 = vpop.f32.mrf.mxu1 }
 0x292   :  { %v1934_v15 = vpop.f32.mrf.mxu1 }
 0x293   :  { %805 = vrot.lane.b32.xlu0 %v1934_v15, %s2179_s6  ;;  %1952 = vmatpush3.xpose.msk.msra.mxu1 %vm198_vm4, %v1934_v15 }
 0x294   :  { %v559_v16 = vpop.f32.mrf.mxu1  ;;  %1953 = vmatprep.subr.mxu1 %v2176_v2 }
 0x295   :  { %801 = vrot.lane.b32.xlu1 %v559_v16, %s2179_s6 }
 0x296   :  { %v1937_v17 = vpop.f32.mrf.mxu1 }
 0x297   :  { %803 = vrot.lane.b32.xlu0 %v1933_v13, %s2179_s6  ;;  %1954 = vmatpush3.xpose.msk.msra.mxu1 %vm198_vm4, %v1933_v13 }
 0x298   :  { %v572_v18 = vpop.f32.mrf.mxu1  ;;  %1955 = vmatprep.subr.mxu1 %v2176_v2 }
 0x299   :  { %799 = vrot.lane.b32.xlu1 %v556_v14, %s2179_s6 }
 0x29a   :  { %v1938_v19 = vpop.f32.mrf.mxu1 }
 0x29b   :  { %797 = vrot.lane.b32.xlu0 %v1930_v11, %s2179_s6  ;;  %1956 = vmatpush3.xpose.msk.msra.mxu1 %vm198_vm4, %v559_v16 }
 0x29c   :  { %v575_v20 = vpop.f32.mrf.mxu1  ;;  %1957 = vmatprep.subr.mxu1 %v2176_v2 }
 0x29d   :  { %795 = vrot.lane.b32.xlu1 %v1929_v7, %s2179_s6 }
 0x29e   :  { %v1941_v21 = vpop.f32.mrf.mxu1 }
 0x29f   :  { %793 = vrot.lane.b32.xlu0 %v543_v12, %s2179_s6  ;;  %1958 = vmatpush3.xpose.msk.msra.mxu1 %vm198_vm4, %v556_v14 }
 0x2a0   :  { %v588_v23 = vpop.f32.mrf.mxu1  ;;  %1959 = vmatprep.subr.mxu1 %v2176_v2 }
 0x2a1   :  { %791 = vrot.lane.b32.xlu1 %v540_v9, %s2179_s6 }
 0x2a2   :  { %v1942_v24 = vpop.f32.mrf.mxu1 }
 0x2a3   :  { %1960 = vmatpush3.xpose.msk.msra.mxu1 %vm198_vm4, %v1930_v11  ;;  %789 = vrot.lane.b32.xlu0 %v2454_v56, %s2179_s6 }
 0x2a4   :  { %1961 = vmatprep.subr.mxu1 %v2176_v2  ;;  %v591_v25 = vpop.f32.mrf.mxu1 }
 0x2a5   :  { %1075 = vrot.lane.b32.xlu1 %v1942_v24, %s2179_s6 }
 0x2a7   :  { %1962 = vmatpush3.xpose.msk.msra.mxu1 %vm198_vm4, %v1929_v7  ;;  %1073 = vrot.lane.b32.xlu0 %v1941_v21, %s2179_s6 }
 0x2a8   :  { %1963 = vmatprep.subr.mxu1 %v2176_v2 }
 0x2a9   :  { %1071 = vrot.lane.b32.xlu1 %v591_v25, %s2179_s6 }
 0x2ab   :  { %1964 = vmatpush3.xpose.msk.msra.mxu1 %vm198_vm4, %v543_v12  ;;  %1069 = vrot.lane.b32.xlu0 %v588_v23, %s2179_s6 }
 0x2ac   :  { %1965 = vmatprep.subr.mxu1 %v2176_v2 }
 0x2ad   :  { %1067 = vrot.lane.b32.xlu1 %v1938_v19, %s2179_s6 }
 0x2af   :  { %1966 = vmatpush3.xpose.msk.msra.mxu1 %vm198_vm4, %v540_v9  ;;  %1065 = vrot.lane.b32.xlu0 %v1937_v17, %s2179_s6 }
 0x2b0   :  { %1989 = vmatprep.subr.mxu1 %v2176_v2 }
 0x2b1   :  { %1063 = vrot.lane.b32.xlu1 %v575_v20, %s2179_s6 }
 0x2b2   :  { %1968 = vmatmul.mubr.msk.f32.vlgmr.msra.gmra.mxu1 %vm198_vm4, %v2454_v56 }
 0x2b3   :  { %1061 = vrot.lane.b32.xlu0 %v572_v18, %s2179_s6  ;;  %1990 = vmatpush3.xpose.msk.msra.mxu1 %vm198_vm4, %v1942_v24 }
 0x2b4   :  { %1991 = vmatprep.subr.mxu1 %v2176_v2  ;;  %2005 = vmatprep.mubr.msk.f32.mxu1 %vm2177_vm0, %v2176_v2 }
 0x2b5   :  { %1059 = vrot.lane.b32.xlu1 %v928_v26, %s2179_s6 }
 0x2b7   :  { %1992 = vmatpush3.xpose.msk.msra.mxu1 %vm198_vm4, %v1941_v21 }
 0x2b8   :  { %1993 = vmatprep.subr.mxu1 %v2176_v2 }
 0x2b9   :  { %1188 = vrot.lane.b32.xlu1 %v1049_v27, %s2179_s6 }
 0x2bb   :  { %1994 = vmatpush3.xpose.msk.msra.mxu1 %vm198_vm4, %v591_v25 }
 0x2bc   :  { %1995 = vmatprep.subr.mxu1 %v2176_v2 }
 0x2bf   :  { %1996 = vmatpush3.xpose.msk.msra.mxu1 %vm198_vm4, %v588_v23 }
 0x2c0   :  { %1997 = vmatprep.subr.mxu1 %v2176_v2 }
 0x2c3   :  { %1998 = vmatpush3.xpose.msk.msra.mxu1 %vm198_vm4, %v1938_v19 }
 0x2c4   :  { %1999 = vmatprep.subr.mxu1 %v2176_v2 }
 0x2c7   :  { %2000 = vmatpush3.xpose.msk.msra.mxu1 %vm198_vm4, %v1937_v17 }
 0x2c8   :  { %2001 = vmatprep.subr.mxu1 %v2176_v2 }
 0x2cb   :  { %2002 = vmatpush3.xpose.msk.msra.mxu1 %vm198_vm4, %v575_v20 }
 0x2cc   :  { %2003 = vmatprep.subr.mxu1 %v2176_v2 }
 0x2cf   :  { %2004 = vmatpush3.xpose.msk.msra.mxu1 %vm198_vm4, %v572_v18 }
 0x2d0   :  { %2027 = vmatprep.subr.mxu1 %v2176_v2 }
 0x2d2   :  { %2006 = vmatmul.mubr.msk.f32.vlgmr.msra.gmra.mxu1 %vm198_vm4, %v928_v26 }
 0x2d3   :  { %2043 = vmatprep.mubr.msk.f32.mxu1 %vm2177_vm0, %v2176_v2 }
 0x305   :  { %v806_v28 = vpop.permute.xlu0 %805 }
 0x306   :  { %1971 = vmatpush3.xpose.msk.msra.mxu0 %vm198_vm4, %v806_v28 }
 0x307   :  { %1972 = vmatprep.subr.mxu0 %v2176_v2  ;;  %v802_v30 = vpop.permute.xlu1 %801 }
 0x309   :  { %v804_v29 = vpop.permute.xlu0 %803 }
 0x30a   :  { %1973 = vmatpush3.xpose.msk.msra.mxu0 %vm198_vm4, %v804_v29 }
 0x30b   :  { %1974 = vmatprep.subr.mxu0 %v2176_v2  ;;  %v800_v31 = vpop.permute.xlu1 %799 }
 0x30d   :  { %v798_v32 = vpop.permute.xlu0 %797 }
 0x30e   :  { %1975 = vmatpush3.xpose.msk.msra.mxu0 %vm198_vm4, %v802_v30 }
 0x30f   :  { %1976 = vmatprep.subr.mxu0 %v2176_v2  ;;  %v796_v33 = vpop.permute.xlu1 %795 }
 0x311   :  { %v794_v34 = vpop.permute.xlu0 %793 }
 0x312   :  { %1977 = vmatpush3.xpose.msk.msra.mxu0 %vm198_vm4, %v800_v31 }
 0x313   :  { %1978 = vmatprep.subr.mxu0 %v2176_v2  ;;  %v792_v35 = vpop.permute.xlu1 %791 }
 0x315   :  { %v790_v36 = vpop.permute.xlu0 %789 }
 0x316   :  { %1979 = vmatpush3.xpose.msk.msra.mxu0 %vm198_vm4, %v798_v32 }
 0x317   :  { %1980 = vmatprep.subr.mxu0 %v2176_v2  ;;  %v1076_v37 = vpop.permute.xlu1 %1075 }
 0x319   :  { %v1074_v39 = vpop.permute.xlu0 %1073 }
 0x31a   :  { %1981 = vmatpush3.xpose.msk.msra.mxu0 %vm198_vm4, %v796_v33 }
 0x31b   :  { %1982 = vmatprep.subr.mxu0 %v2176_v2  ;;  %v1072_v40 = vpop.permute.xlu1 %1071 }
 0x31d   :  { %v1070_v41 = vpop.permute.xlu0 %1069 }
 0x31e   :  { %1983 = vmatpush3.xpose.msk.msra.mxu0 %vm198_vm4, %v794_v34 }
 0x31f   :  { %1984 = vmatprep.subr.mxu0 %v2176_v2  ;;  %v1068_v42 = vpop.permute.xlu1 %1067 }
 0x321   :  { %v1066_v43 = vpop.permute.xlu0 %1065 }
 0x322   :  { %1985 = vmatpush3.xpose.msk.msra.mxu0 %vm198_vm4, %v792_v35 }
 0x323   :  { %2008 = vmatprep.subr.mxu0 %v2176_v2  ;;  %v1064_v44 = vpop.permute.xlu1 %1063 }
 0x325   :  { %1987 = vmatmul.mubr.msk.f32.vlgmr.msra.gmra.mxu0 %vm198_vm4, %v790_v36  ;;  %v1062_v45 = vpop.permute.xlu0 %1061 }
 0x326   :  { %2009 = vmatpush3.xpose.msk.msra.mxu0 %vm198_vm4, %v1076_v37  ;;  %2024 = vmatprep.mubr.msk.f32.mxu0 %vm2177_vm0, %v2176_v2 }
 0x327   :  { %2010 = vmatprep.subr.mxu0 %v2176_v2  ;;  %v1060_v46 = vpop.permute.xlu1 %1059 }
 0x32a   :  { %2011 = vmatpush3.xpose.msk.msra.mxu0 %vm198_vm4, %v1074_v39 }
 0x32b   :  { %2012 = vmatprep.subr.mxu0 %v2176_v2 }
 0x32e   :  { %2013 = vmatpush3.xpose.msk.msra.mxu0 %vm198_vm4, %v1072_v40 }
 0x32f   :  { %2014 = vmatprep.subr.mxu0 %v2176_v2 }
 0x332   :  { %2015 = vmatpush3.xpose.msk.msra.mxu0 %vm198_vm4, %v1070_v41 }
 0x333   :  { %2016 = vmatprep.subr.mxu0 %v2176_v2 }
 0x336   :  { %2017 = vmatpush3.xpose.msk.msra.mxu0 %vm198_vm4, %v1068_v42 }
 0x337   :  { %2018 = vmatprep.subr.mxu0 %v2176_v2 }
 0x33a   :  { %2019 = vmatpush3.xpose.msk.msra.mxu0 %vm198_vm4, %v1066_v43 }
 0x33b   :  { %2020 = vmatprep.subr.mxu0 %v2176_v2 }
 0x33e   :  { %2021 = vmatpush3.xpose.msk.msra.mxu0 %vm198_vm4, %v1064_v44 }
 0x33f   :  { %2022 = vmatprep.subr.mxu0 %v2176_v2 }
 0x342   :  { %2023 = vmatpush3.xpose.msk.msra.mxu0 %vm198_vm4, %v1062_v45 }
 0x343   :  { %2046 = vmatprep.subr.mxu0 %v2176_v2 }
 0x345   :  { %2025 = vmatmul.mubr.msk.f32.vlgmr.msra.gmra.mxu0 %vm198_vm4, %v1060_v46 }
 0x346   :  { %2054 = vmatprep.mubr.msk.f32.mxu0 %vm2177_vm0, %v2176_v2 }
 0x372   :  { %v752_v47 = vpop.f32.mrf.mxu1 }
 0x373   :  { %v757_v9 = vsel %vm756_vm8, %v752_v47, -inf }
 0x374   :  { %v1969_v48 = vpop.f32.mrf.mxu1  ;;  %v758_v11 = vrot.slane %v757_v9, 4 }
 0x376   :  { %v759_v14 = vmax.f32 %v757_v9, %v758_v11 }
 0x378   :  { %v760_v16 = vrot.slane %v759_v14, 2 }
 0x37a   :  { %v761_v18 = vmax.f32 %v759_v14, %v760_v16  ;;  %v1757_v14 = vld [vmem:[%s2678_s10 + $0x18] sm:$0xff]  }
 0x37b   :  { %v1729_v16 = vunpack.c.h.bf16 %v1757_v14 }
 0x37c   :  { %v762_v20 = vrot.slane %v761_v18, 1 }
 0x37d   :  { %2028 = vmatpush3.msra.mxu1 %v1729_v16 }
 0x37e   :  { %v763_v23 = vmax.f32 %v761_v18, %v762_v20  ;;  %2029 = vmatprep.subr.mxu1 %v2176_v2 }
 0x380   :  { %v764_v25 = vsub.f32 %v752_v47, %v763_v23 }
 0x382   :  { %v765_v28 = vmul.f32 1.442695, %v764_v25 }
 0x392   :  { %v1021_v49 = vpop.f32.mrf.mxu1 }
 0x393   :  { %v1025_v50 = vsel %vm756_vm8, %v1021_v49, -inf }
 0x394   :  { %v1026_v51 = vrot.slane %v1025_v50, 4  ;;  %v2007_v52 = vpop.f32.mrf.mxu1 }
 0x396   :  { %v1027_v53 = vmax.f32 %v1025_v50, %v1026_v51 }
 0x398   :  { %v1028_v54 = vrot.slane %v1027_v53, 2 }
 0x39a   :  { %v1029_v55 = vmax.f32 %v1027_v53, %v1028_v54 }
 0x39c   :  { %v1030_v56 = vrot.slane %v1029_v55, 1 }
 0x39e   :  { %v1031_v57 = vmax.f32 %v1029_v55, %v1030_v56 }
 0x3a0   :  { %v1032_v58 = vsub.f32 %v1021_v49, %v1031_v57 }
 0x3a2   :  { %v1033_v59 = vmul.f32 1.442695, %v1032_v58 }
 0x3a4   :  { %2110 = vpow2.f32 %v1033_v59 }
 0x3b1   :  { %v2111_v60 = vpop.eup %2110 }
 0x3b2   :  { %v1035_v61 = vsel %vm756_vm8, %v2111_v60, 0.0 }
 0x3b3   :  { %v1036_v62 = vrot.slane %v1035_v61, 4 }
 0x3b5   :  { %v1037_v63 = vadd.f32 %v1036_v62, %v1035_v61 }
 0x3b7   :  { %v1038_v3 = vrot.slane %v1037_v63, 2 }
 0x3b9   :  { %v1039_v0 = vadd.f32 %v1038_v3, %v1037_v63 }
 0x3bb   :  { %v1040_v4 = vrot.slane %v1039_v0, 1 }
 0x3bd   :  { %v1041_v5 = vadd.f32 %v1040_v4, %v1039_v0 }
 0x3bf   :  { %2112 = vrcp.f32 %v1041_v5 }
 0x3c0   :  { %2114 = vpow2.f32 %v765_v28  ;;  %v1715_v28 = vld [vmem:[%s2678_s10] sm:$0xff]  }
 0x3cc   :  { %v2113_v6 = vpop.eup %2112 }
 0x3cd   :  { %v1043_v7 = vmul.f32 %v2113_v6, %v2111_v60  ;;  %v2115_v41 = vpop.eup %2114 }
 0x3ce   :  { %v767_v44 = vsel %vm756_vm8, %v2115_v41, 0.0 }
 0x3cf   :  { %v1044_v8 = vsel %vm756_vm8, %v1043_v7, 0.0  ;;  %v768_v46 = vrot.slane %v767_v44, 4 }
 0x3d0   :  { %1045 = vadd.xlane.f32.xlu1 %v1044_v8 }
 0x3d1   :  { %v769_v48 = vadd.f32 %v768_v46, %v767_v44 }
 0x3d3   :  { %v770_v50 = vrot.slane %v769_v48, 2 }
 0x3d5   :  { %v771_v54 = vadd.f32 %v770_v50, %v769_v48 }
 0x3d7   :  { %v772_v58 = vrot.slane %v771_v54, 1 }
 0x3d9   :  { %v773_v62 = vadd.f32 %v772_v58, %v771_v54 }
 0x3e5   :  { %v891_v10 = vpop.f32.mrf.mxu0 }
 0x3e6   :  { %v895_v13 = vsel %vm756_vm8, %v891_v10, -inf }
 0x3e7   :  { %v1988_v12 = vpop.f32.mrf.mxu0  ;;  %v896_v15 = vrot.slane %v895_v13, 4 }
 0x3e9   :  { %v897_v17 = vmax.f32 %v895_v13, %v896_v15  ;;  %v1756_v15 = vld [vmem:[%s2678_s10 + $0x10] sm:$0xff]  }
 0x3ea   :  { %v1725_v18 = vunpack.c.h.bf16 %v1756_v15  ;;  %v1724_v20 = vunpack.c.l.bf16 %v1756_v15 }
 0x3eb   :  { %v898_v19 = vrot.slane %v897_v17, 2 }
 0x3ed   :  { %v899_v21 = vmax.f32 %v897_v17, %v898_v19  ;;  %v1728_v17 = vunpack.c.l.bf16 %v1757_v14  ;;  %v1755_v19 = vld [vmem:[%s2678_s10 + $0x8] sm:$0xff]   ;;  %v1731_v14 = vld [vmem:[%s2679_s11] sm:$0xff]  }
 0x3ee   :  { %v1720_v23 = vunpack.c.l.bf16 %v1755_v19 }
 0x3ef   :  { %v900_v24 = vrot.slane %v899_v21, 1  ;;  %2030 = vmatpush3.msra.mxu1 %v1728_v17  ;;  %v1733_v17 = vunpack.c.h.bf16 %v1731_v14 }
 0x3f0   :  { %2031 = vmatprep.subr.mxu1 %v2176_v2 }
 0x3f1   :  { %v901_v26 = vmax.f32 %v899_v21, %v900_v24  ;;  %2032 = vmatpush3.msra.mxu1 %v1725_v18  ;;  %v1721_v21 = vunpack.c.h.bf16 %v1755_v19  ;;  %v1732_v18 = vunpack.c.l.bf16 %v1731_v14 }
 0x3f2   :  { %2033 = vmatprep.subr.mxu1 %v2176_v2 }
 0x3f3   :  { %v902_v29 = vsub.f32 %v891_v10, %v901_v26  ;;  %2034 = vmatpush3.msra.mxu1 %v1724_v20  ;;  %v1189_v26 = vpop.permute.xlu1 %1188  ;;  %v1739_v20 = vld [vmem:[%s2680_s12] sm:$0xff]  }
 0x3f4   :  { %2035 = vmatprep.subr.mxu1 %v2176_v2 }
 0x3f5   :  { %v903_v32 = vmul.f32 1.442695, %v902_v29  ;;  %2036 = vmatpush3.msra.mxu1 %v1721_v21  ;;  %v1741_v21 = vunpack.c.h.bf16 %v1739_v20 }
 0x3f6   :  { %2037 = vmatprep.subr.mxu1 %v2176_v2 }
 0x3f7   :  { %2116 = vpow2.f32 %v903_v32  ;;  %2038 = vmatpush3.msra.mxu1 %v1720_v23  ;;  %v1716_v32 = vunpack.c.l.bf16 %v1715_v28  ;;  %v1740_v23 = vunpack.c.l.bf16 %v1739_v20 }
 0x3f8   :  { %2039 = vmatprep.subr.mxu1 %v2176_v2 }
 0x404   :  { %v2117_v45 = vpop.eup %2116 }
 0x405   :  { %v1161_v30 = vpop.f32.mrf.mxu0  ;;  %v905_v47 = vsel %vm756_vm8, %v2117_v45, 0.0 }
 0x406   :  { %v1165_v31 = vsel %vm756_vm8, %v1161_v30, -inf  ;;  %v906_v49 = vrot.slane %v905_v47, 4 }
 0x407   :  { %v1166_v33 = vrot.slane %v1165_v31, 4  ;;  %v2026_v34 = vpop.f32.mrf.mxu0 }
 0x408   :  { %v907_v51 = vadd.f32 %v906_v49, %v905_v47 }
 0x409   :  { %v1167_v35 = vmax.f32 %v1165_v31, %v1166_v33 }
 0x40a   :  { %v908_v55 = vrot.slane %v907_v51, 2 }
 0x40b   :  { %v1168_v36 = vrot.slane %v1167_v35, 2 }
 0x40c   :  { %v909_v60 = vadd.f32 %v908_v55, %v907_v51 }
 0x40d   :  { %v1169_v37 = vmax.f32 %v1167_v35, %v1168_v36 }
 0x40e   :  { %v910_v3 = vrot.slane %v909_v60, 1 }
 0x40f   :  { %v1170_v39 = vrot.slane %v1169_v37, 1 }
 0x410   :  { %v911_v4 = vadd.f32 %v910_v3, %v909_v60 }
 0x411   :  { %v1171_v40 = vmax.f32 %v1169_v37, %v1170_v39 }
 0x413   :  { %v1172_v42 = vsub.f32 %v1161_v30, %v1171_v40  ;;  %v1717_v30 = vunpack.c.h.bf16 %v1715_v28  ;;  %v1759_v40 = vld [vmem:[%s2680_s12 + $0x8] sm:$0xff]  }
 0x414   :  { %v1744_v19 = vunpack.c.l.bf16 %v1759_v40 }
 0x415   :  { %v1173_v43 = vmul.f32 1.442695, %v1172_v42  ;;  %2040 = vmatpush3.msra.mxu1 %v1717_v30 }
 0x416   :  { %2041 = vmatprep.subr.mxu1 %v2176_v2 }
 0x417   :  { %2118 = vpow2.f32 %v1173_v43  ;;  %2042 = vmatpush3.msra.mxu1 %v1716_v32 }
 0x418   :  { %2120 = vrcp.f32 %v773_v62  ;;  %2057 = vmatprep.subr.mxu1 %v2176_v2 }
 0x424   :  { %v2119_v52 = vpop.eup %2118 }
 0x425   :  { %v1175_v53 = vsel %vm756_vm8, %v2119_v52, 0.0  ;;  %v2121_v5 = vpop.eup %2120 }
 0x426   :  { %v1176_v56 = vrot.slane %v1175_v53, 4  ;;  %v775_v9 = vmul.f32 %v2121_v5, %v2115_v41  ;;  %v1745_v41 = vunpack.c.h.bf16 %v1759_v40 }
 0x428   :  { %v1177_v57 = vadd.f32 %v1176_v56, %v1175_v53  ;;  %v776_v11 = vsel %vm756_vm8, %v775_v9, 0.0  ;;  %2047 = vmatpush3.msra.mxu0 %v1745_v41 }
 0x429   :  { %2048 = vmatprep.subr.mxu0 %v2176_v2 }
 0x42a   :  { %v1178_v59 = vrot.slane %v1177_v57, 2  ;;  %2049 = vmatpush3.msra.mxu0 %v1744_v19 }
 0x42b   :  { %2050 = vmatprep.subr.mxu0 %v2176_v2 }
 0x42c   :  { %v1179_v61 = vadd.f32 %v1178_v59, %v1177_v57  ;;  %2051 = vmatpush3.msra.mxu0 %v1741_v21 }
 0x42d   :  { %2052 = vmatprep.subr.mxu0 %v2176_v2 }
 0x42e   :  { %v1180_v63 = vrot.slane %v1179_v61, 1  ;;  %2053 = vmatpush3.msra.mxu0 %v1740_v23 }
 0x42f   :  { %2068 = vmatprep.subr.mxu0 %v2176_v2 }
 0x430   :  { %v1181_v0 = vadd.f32 %v1180_v63, %v1179_v61 }
 0x432   :  { %2122 = vrcp.f32 %v1181_v0 }
 0x433   :  { %2124 = vrcp.f32 %v911_v4 }
 0x43f   :  { %v2123_v6 = vpop.eup %2122 }
 0x440   :  { %v1183_v7 = vmul.f32 %v2123_v6, %v2119_v52  ;;  %v2125_v10 = vpop.eup %2124 }
 0x441   :  { %v913_v12 = vmul.f32 %v2125_v10, %v2117_v45 }
 0x442   :  { %v1184_v8 = vsel %vm756_vm8, %v1183_v7, 0.0  ;;  %v1758_v7 = vld [vmem:[%s2679_s11 + $0x8] sm:$0xff]  }
 0x443   :  { %1185 = vadd.xlane.f32.xlu0 %v1184_v8  ;;  %v914_v13 = vsel %vm756_vm8, %v913_v12, 0.0  ;;  %v1737_v12 = vunpack.c.h.bf16 %v1758_v7  ;;  %v1736_v16 = vunpack.c.l.bf16 %v1758_v7 }
 0x447   :  { %777 = vadd.xlane.f32.xlu0 %v776_v11 }
 0x44b   :  { %915 = vadd.xlane.f32.xlu0 %v914_v13 }
 0x459   :  { %v1046_v43 = vpop.xlane.xlu1 %1045 }
 0x45a   :  { %v1047_v45 = vmul.f32 0.015625, %v1046_v43 }
 0x45c   :  { %v1051_v48 = vmul.f32 %v1049_v27, %v1047_v45 }
 0x45e   :  { %v1052_v51 = vsel %vm781_vm9, %v1051_v48, 0.0  ;;  %v1697_v48 = vld [vmem:[%s2682_s14] ss:$0 sm:$0xff] }
 0x45f   :  { %v1053_v54 = vrot.slane %v1052_v51, 4 }
 0x461   :  { %v1054_v57 = vadd.f32 %v1053_v54, %v1052_v51 }
 0x463   :  { %v1055_v60 = vrot.slane %v1054_v57, 2 }
 0x465   :  { %v1056_v27 = vadd.f32 %v1055_v60, %v1054_v57 }
 0x467   :  { %v1057_v4 = vrot.slane %v1056_v27, 1 }
 0x469   :  { %v1058_v6 = vadd.f32 %v1057_v4, %v1056_v27 }
 0x4cc   :  { %v1186_v24 = vpop.xlane.xlu0 %1185 }
 0x4cd   :  { %v1187_v25 = vmul.f32 0.015625, %v1186_v24 }
 0x4cf   :  { %v1191_v29 = vmul.f32 %v1189_v26, %v1187_v25 }
 0x4d0   :  { %v778_v42 = vpop.xlane.xlu0 %777 }
 0x4d1   :  { %v1192_v31 = vsel %vm781_vm9, %v1191_v29, 0.0  ;;  %v779_v47 = vmul.f32 0.015625, %v778_v42  ;;  %v1695_v42 = vld [vmem:[%s2681_s13] ss:$0 sm:$0xff]  ;;  %s2181_s13 = smov [#allocation4]  }
 0x4d2   :  { %v1193_v33 = vrot.slane %v1192_v31, 4 }
 0x4d3   :  { %v780_v50 = vmul.f32 %v779_v47, %v2459_v1 }
 0x4d4   :  { %v1194_v34 = vadd.f32 %v1193_v33, %v1192_v31  ;;  %v916_v44 = vpop.xlane.xlu0 %915  ;;  %v1760_v31 = vld [vmem:[%s2686_s18 + $0x8] sm:$0xff]  }
 0x4d5   :  { %v917_v46 = vmul.f32 0.015625, %v916_v44  ;;  %v782_v53 = vsel %vm781_vm9, %v780_v50, 0.0  ;;  %v1753_v32 = vunpack.c.h.bf16 %v1760_v31  ;;  %v1752_v33 = vunpack.c.l.bf16 %v1760_v31 }
 0x4d6   :  { %v1195_v35 = vrot.slane %v1194_v34, 2  ;;  %v783_v56 = vrot.slane %v782_v53, 4 }
 0x4d7   :  { %v918_v49 = vmul.f32 %v917_v46, %v2459_v1 }
 0x4d8   :  { %v1196_v36 = vadd.f32 %v1195_v35, %v1194_v34  ;;  %v784_v59 = vadd.f32 %v783_v56, %v782_v53 }
 0x4d9   :  { %v920_v52 = vsel %vm919_vm10, %v918_v49, 0.0  ;;  %v1698_v49 = vld [vmem:[%s2683_s15] ss:$0 sm:$0xff] }
 0x4da   :  { %v1197_v37 = vrot.slane %v1196_v36, 1  ;;  %v921_v55 = vrot.slane %v920_v52, 4  ;;  %v785_v62 = vrot.slane %v784_v59, 2 }
 0x4dc   :  { %v1198_v39 = vadd.f32 %v1197_v37, %v1196_v36  ;;  %v922_v58 = vadd.f32 %v921_v55, %v920_v52  ;;  %v786_v3 = vadd.f32 %v785_v62, %v784_v59  ;;  %v1476_v36 = vld [vmem:[%s2685_s17] sm:$0x1] }
 0x4dd   :  { %v1477_v37 = vadd.f32 1e-05, %v1476_v36 }
 0x4de   :  { %1200 = vrot.lane.b32.xlu0 %v1198_v39, %s2180_s4  ;;  %v923_v61 = vrot.slane %v922_v58, 2  ;;  %v787_v1 = vrot.slane %v786_v3, 1  ;;  %v1482_v39 = vsub.s32 0, %v2357_v22 }
 0x4df   :  { %2126 = vrsqrt.f32 %v1477_v37 }
 0x4e0   :  { %v924_v63 = vadd.f32 %v923_v61, %v922_v58  ;;  %v788_v9 = vadd.f32 %v787_v1, %v786_v3 }
 0x4e2   :  { %v925_v0 = vrot.slane %v924_v63, 1 }
 0x4e4   :  { %v926_v5 = vadd.f32 %v925_v0, %v924_v63 }
 0x4e6   :  { %v927_v13 = vsel %vm198_vm4, %v788_v9, %v926_v5 }
 0x4ec   :  { %v2127_v40 = vpop.eup %2126 }
 0x4ed   :  { %v1483_v46 = vrot.slane %v2127_v40, %v1482_v39 }
 0x550   :  { %v1201_v8 = vpop.permute.xlu0 %1200 }
 0x551   :  { %v1203_v10 = vsel %vm198_vm4, %v1058_v6, %v1201_v8 }
 0x552   :  { %v1205_v11 = vrot.slane %v1203_v10, 7 }
 0x554   :  { %v1208_v15 = vsel %vm1207_vm11, %v927_v13, %v1205_v11 }
 0x555   :  { %2044 = vmatmul.mubr.msk.f32.vlgmr.msra.gmra.mxu1 %vm1225_vm12, %v1208_v15 }
 0x556   :  { %2058 = vmatpush3.msra.mxu1 %v1737_v12  ;;  %2065 = vmatprep.mubr.msk.f32.mxu1 %vm2177_vm0, %v2176_v2 }
 0x557   :  { %2059 = vmatprep.subr.mxu1 %v2176_v2 }
 0x558   :  { %2060 = vmatpush3.msra.mxu1 %v1736_v16 }
 0x559   :  { %2061 = vmatprep.subr.mxu1 %v2176_v2 }
 0x55a   :  { %2062 = vmatpush3.msra.mxu1 %v1733_v17 }
 0x55b   :  { %2063 = vmatprep.subr.mxu1 %v2176_v2 }
 0x55c   :  { %2064 = vmatpush3.msra.mxu1 %v1732_v18 }
 0x55d   :  { %2066 = vmatmul.mubr.msk.f32.vlgmr.msra.gmra.mxu1 %vm198_vm4, %v2391_v38 }
 0x615   :  { %v1295_v24 = vpop.f32.mrf.mxu1 }
 0x616   :  { %v1299_v25 = vmul.f32 0.5, %v1295_v24 }
 0x617   :  { %v2045_v26 = vpop.f32.mrf.mxu1 }
 0x618   :  { %v1300_v28 = vadd.f32 %v1299_v25, %v2391_v38  ;;  %v1747_v38 = vld [vmem:[%s2686_s18] sm:$0xff]  }
 0x619   :  { %v1749_v34 = vunpack.c.h.bf16 %v1747_v38  ;;  %v1748_v35 = vunpack.c.l.bf16 %v1747_v38 }
 0x61a   :  { %2055 = vmatmul.mubr.msk.f32.vlgmr.msra.gmra.mxu0 %vm198_vm4, %v1300_v28 }
 0x61b   :  { %2076 = vmatprep.mubr.msk.f32.mxu0 %vm2177_vm0, %v2176_v2  ;;  %2069 = vmatpush3.msra.mxu0 %v1753_v32 }
 0x61c   :  { %2070 = vmatprep.subr.mxu0 %v2176_v2 }
 0x61d   :  { %v1456_v29 = vpop.f32.mrf.mxu1  ;;  %2071 = vmatpush3.msra.mxu0 %v1752_v33 }
 0x61e   :  { %2072 = vmatprep.subr.mxu0 %v2176_v2 }
 0x61f   :  { %v2067_v30 = vpop.f32.mrf.mxu1  ;;  %2073 = vmatpush3.msra.mxu0 %v1749_v34 }
 0x620   :  { %2074 = vmatprep.subr.mxu0 %v2176_v2  ;;  %v1696_v2 = vld [vmem:[%s2684_s16] ss:$0 sm:$0xff]  ;;  %s1615_s16 = sshll.u32 %s2181_s13, 4  ;;  %s1616_s16 = int_to_ptr.vmem [resolvable:$true] %s1615_s16 }
 0x621   :  { %2075 = vmatpush3.msra.mxu0 %v1748_v35  ;;  %s2132_s0 = scalar_lea.vmem %s1616_s16, 32  ;;  %p2137_p1 = scmp.lt.s32.totalorder %s1616_s16, %s1616_s16 }
 0x622   :  { %p2133_p0 = scmp.ne.s32.totalorder %s1616_s16, %s2132_s0  ;;  %p2138_p2 = scmp.lt.s32.totalorder %s2132_s0, %s2132_s0 }
 0x624   :  { %p2139_p3 = por %p2138_p2, %p2137_p1 }
 0x626   :  { %p2140_p4 = pnand %p2139_p3, %p2133_p0 }
 0x6da   :  { %v1386_v41 = vpop.f32.mrf.mxu0 }
 0x6db   :  { %v1457_v43 = vadd.f32 %v1456_v29, %v1386_v41 }
 0x6dc   :  { %v2056_v44 = vpop.f32.mrf.mxu0 }
 0x6dd   :  { %v1467_v45 = vadd.f32 %v1695_v42, %v1457_v43 }
 0x6df   :  { %v1475_v47 = vsub.f32 %v1467_v45, %v1696_v2 }
 0x6e1   :  { %v1485_v22 = vmul.f32 %v1483_v46, %v1475_v47 }
 0x6e3   :  { %v1493_v50 = vmul.f32 %v1697_v48, %v1485_v22 }
 0x6e5   :  { %v1501_v51 = vadd.f32 %v1698_v49, %v1493_v50 }
 0x6e7   :  { %v1502_v52 = vmax.f32 %v1501_v51, 0.0 }
 0x6e9   :  { %2077 = vmatmul.mubr.msk.f32.vlgmr.msra.gmra.mxu0 %vm198_vm4, %v1502_v52 }
 0x6ea   :  { %2143 = shalt.err (!%p2140_p4)
}
 0x6eb   :  { %1618 = dma.vmem_to_hbm [thread:$0]  %s1616_s16, 32, %s2689_s21, [#allocation5]   ;;  %v1699_v53 = vld [vmem:[%s2687_s19] ss:$0 sm:$0xff]  ;;  %vm1597_vm13 = vcmask 123904  }
 0x6ec   :  { %s2182_s4 = smov [#allocation2]  }
 0x6ed   :  { %s1605_s30 = sshll.u32 %s2182_s4, 4  ;;  %s1606_s30 = int_to_ptr.vmem [resolvable:$true] %s1605_s30 }
 0x6ee   :  { %s2152_s5 = scalar_lea.vmem %s1606_s30, 32  ;;  %p2157_p6 = scmp.lt.s32.totalorder %s1606_s30, %s1606_s30 }
 0x6ef   :  { %p2153_p5 = scmp.ne.s32.totalorder %s1606_s30, %s2152_s5  ;;  %p2158_p7 = scmp.lt.s32.totalorder %s2152_s5, %s2152_s5 }
 0x6f1   :  { %p2159_p8 = por %p2158_p7, %p2157_p6 }
 0x6f3   :  { %p2160_p9 = pnand %p2159_p8, %p2153_p5 }
 0x7a9   :  { %v1587_v54 = vpop.f32.mrf.mxu0 }
 0x7aa   :  { %v1588_v55 = vadd.f32 %v1699_v53, %v1587_v54 }
 0x7ab   :  { %v2078_v56 = vpop.f32.mrf.mxu0 }
 0x7ac   :  { %v1701_v57 = vmul.f32 -1.442695, %v1588_v55 }
 0x7ae   :  { %2128 = vpow2.f32 %v1701_v57 }
 0x7bb   :  { %v2129_v58 = vpop.eup %2128 }
 0x7bc   :  { %v1594_v59 = vadd.f32 1.0, %v2129_v58 }
 0x7be   :  { %2130 = vrcp.f32 %v1594_v59 }
 0x7cb   :  { %v2131_v60 = vpop.eup %2130 }
 0x7cc   :  { %1598 = vst.msk [vmem:[#allocation2] sm:$0x3] %vm1597_vm13, %v2131_v60 }
 0x7cd   :  { %2163 = shalt.err (!%p2160_p9)
}
 0x7ce   :  { %1608 = dma.vmem_to_hbm [thread:$0]  %s1606_s30, 32, %s2688_s20, [#allocation3]  }
 0x7cf   :  { %2172 = dma.done.wait [#allocation3], 32  }
 0x7d0   :  { %2173 = vsyncadd [#allocation3], 4294967264 }
 0x7d1   :  { %2174 = dma.done.wait [#allocation5], 32  }
 0x7d2   :  { %2175 = vsyncadd [#allocation5], 4294967264 }
 0x7d3   :  { %1625 = vsyncpa [#allocation3], 1 }
 0x7d4   :  { %1626 = vsyncpa [#allocation5], 1 }

</bundles_post_ra>
